<compile_context>
chip_gen: v6e
topology: v6e:2x2x1
jax: 0.10.0
libtpu: 0.0.40
codegen_flags: <defaults>
</compile_context>

<pallas_src>
import functools
import math

import jax
import jax.numpy as jnp
from jax import lax
from jax.experimental import pallas as pl
from jax.experimental.pallas import tpu as pltpu


# ------------------------------ in-kernel helpers ------------------------------

def _layernorm(x, g, b):
    # x: (R, H) f32, g/b: (1, H) f32
    mu = jnp.mean(x, axis=-1, keepdims=True)
    var = jnp.mean((x - mu) ** 2, axis=-1, keepdims=True)
    return (x - mu) * lax.rsqrt(var + 1e-12) * g + b


def _gelu_tanh(y):
    # TODO(synk): HF BERT uses exact erf-GELU; tanh approximation used (EUP-friendly).
    return 0.5 * y * (1.0 + jnp.tanh(0.7978845608028654 * (y + 0.044715 * y * y * y)))


# ----------------------------- fused encoder-layer kernel ------------------------------

def _encoder_layer_kernel(*refs, batch, seq, hidden, num_heads, head_dim,
                          scale, inv_seq, fuse_input_ln, compute_mean):
    """One full BERT encoder layer, whole batch resident in VMEM.

    Residual stream is a lane-dense (B*S, H) slab.  Inputs (in order):
      x (B*S, H) [f32 for layer 0, bf16 afterwards], mask (B, S) f32,
      [mask_sv (B*S, 1) f32  -- last layer only],
      [input-LN gamma/beta (1, H) -- layer 0 only, fuses the embedding LayerNorm],
      Wqkv (H,3H) bf16, bqkv (1,3H), Wo (H,H) bf16, bo (1,H), ln1 g/b,
      W1 (H,I) bf16, b1 (1,I), W2 (I,H) bf16, b2 (1,H), ln2 g/b.
    Output: hidden slab (B*S, H) bf16, or (B, H) f32 masked-mean sentence vectors (last layer).
    Scratch: ctx (B*S, H) f32 VMEM (per-head attention context written in place).
    """
    f32, bf16 = jnp.float32, jnp.bfloat16
    B, S, H, nH, hd = batch, seq, hidden, num_heads, head_dim

    it = iter(refs)
    x_ref = next(it)
    mask_ref = next(it)
    mask_sv_ref = next(it) if compute_mean else None
    if fuse_input_ln:
        in_g_ref = next(it)
        in_b_ref = next(it)
    wqkv_ref = next(it)
    bqkv_ref = next(it)
    wo_ref = next(it)
    bo_ref = next(it)
    ln1g_ref = next(it)
    ln1b_ref = next(it)
    w1_ref = next(it)
    b1_ref = next(it)
    w2_ref = next(it)
    b2_ref = next(it)
    ln2g_ref = next(it)
    ln2b_ref = next(it)
    out_ref = next(it)
    ctx_ref = next(it)            # (B*S, H) f32 VMEM scratch

    # Residual stream in f32 for all elementwise / LN math.
    x = x_ref[...].astype(f32)                                   # (B*S, H)
    if fuse_input_ln:
        # Embedding LayerNorm fused into layer 0 (saves one full HBM round trip).
        x = _layernorm(x, in_g_ref[...], in_b_ref[...])

    # Additive key bias from the (B, S) mask: 0 for real tokens, -1e4 for pads.
    key_bias = (1.0 - mask_ref[...]) * -10000.0                  # (B, S)

    # Fused QKV projection; single bf16 cast of the (B*S, 3H) temporary.
    qkv = (jnp.dot(x.astype(bf16), wqkv_ref[...], preferred_element_type=f32)
           + bqkv_ref[...]).astype(bf16)                         # (B*S, 3H) bf16

    # Per-(batch, head) attention.  Each head's context is stored directly into the
    # VMEM scratch at static lane offsets: bounds live ranges (score/ctx temporaries die
    # after the store) and avoids any concatenate/relayout of non-128-aligned head slices.
    # NOTE: at real sizes (S=512, hd=64) switch to a q-tiled flash softmax and/or the
    # batched einsum form over (S, nH, hd) so vmatmul pushes pipeline back-to-back.
    for b in range(B):
        rows = slice(b * S, (b + 1) * S)
        kb = key_bias[b:b + 1, :]                                # (1, S), broadcasts over queries
        for h in range(nH):
            lo = h * hd
            qh = qkv[rows, lo:lo + hd]                           # (S, hd) bf16
            kh = qkv[rows, H + lo:H + lo + hd]                   # (S, hd) bf16
            vh = qkv[rows, 2 * H + lo:2 * H + lo + hd]           # (S, hd) bf16
            s = lax.dot_general(qh, kh, (((1,), (1,)), ((), ())),
                                preferred_element_type=f32) * scale   # (S, S) f32
            s = s + kb
            m = jnp.max(s, axis=-1, keepdims=True)
            p = jnp.exp(s - m)
            p = p * pl.reciprocal(jnp.sum(p, axis=-1, keepdims=True), approx=True)
            ctx_ref[rows, lo:lo + hd] = jnp.dot(p.astype(bf16), vh,
                                                preferred_element_type=f32)

    ctx = ctx_ref[...]                                           # (B*S, H) f32

    # Output projection + residual + LayerNorm.
    attn_out = jnp.dot(ctx.astype(bf16), wo_ref[...],
                       preferred_element_type=f32) + bo_ref[...]
    x1 = _layernorm(x + attn_out, ln1g_ref[...], ln1b_ref[...])

    # FFN + residual + LayerNorm.
    inter = jnp.dot(x1.astype(bf16), w1_ref[...],
                    preferred_element_type=f32) + b1_ref[...]
    inter = _gelu_tanh(inter)
    ffn_out = jnp.dot(inter.astype(bf16), w2_ref[...],
                      preferred_element_type=f32) + b2_ref[...]
    x2 = _layernorm(x1 + ffn_out, ln2g_ref[...], ln2b_ref[...])  # (B*S, H) f32

    if compute_mean:
        # sent_vec = (hiddens * mask).sum(S) / S  (matches torch .mean(dim=1) on the
        # pre-masked hiddens).  Pure VPU multiply + sublane reduce — no 1-row MXU matmul.
        masked = x2 * mask_sv_ref[...]                           # (B*S, H) * (B*S, 1)
        for b in range(B):
            sv = jnp.sum(masked[b * S:(b + 1) * S, :], axis=0, keepdims=True) * inv_seq
            out_ref[b:b + 1, :] = sv
    else:
        # Residual stream handed to the next layer in bf16 (halves HBM traffic / VMEM).
        out_ref[...] = x2.astype(out_ref.dtype)


# ------------------------------ thin wrapper ------------------------------

def encoder_layer(x_slab, mask_bs, lp, num_heads, *, batch, seq,
                  in_ln=None, mask_sv=None, compute_mean=False):
    """x_slab: (B*S, H) residual slab.  mask_bs: (B, S) f32 (1 = token, 0 = pad)."""
    BS, H = x_slab.shape
    B, S = batch, seq
    assert BS == B * S
    I = lp["W1"].shape[1]
    hd = H // num_heads

    kernel = functools.partial(
        _encoder_layer_kernel,
        batch=B, seq=S, hidden=H, num_heads=num_heads, head_dim=hd,
        scale=1.0 / math.sqrt(hd), inv_seq=1.0 / S,
        fuse_input_ln=in_ln is not None, compute_mean=compute_mean)

    def full(shape):
        nd = len(shape)
        return pl.BlockSpec(shape, lambda i: (0,) * nd)

    operands = [x_slab, mask_bs]
    in_specs = [full((BS, H)), full((B, S))]
    if compute_mean:
        operands.append(mask_sv)
        in_specs.append(full((BS, 1)))
    if in_ln is not None:
        operands += [in_ln[0], in_ln[1]]
        in_specs += [full((1, H)), full((1, H))]
    operands += [lp["Wqkv"], lp["bqkv"], lp["Wo"], lp["bo"],
                 lp["ln1_g"], lp["ln1_b"], lp["W1"], lp["b1"],
                 lp["W2"], lp["b2"], lp["ln2_g"], lp["ln2_b"]]
    in_specs += [full((H, 3 * H)), full((1, 3 * H)),
                 full((H, H)), full((1, H)),
                 full((1, H)), full((1, H)),
                 full((H, I)), full((1, I)),
                 full((I, H)), full((1, H)),
                 full((1, H)), full((1, H))]

    if compute_mean:
        out_shape = jax.ShapeDtypeStruct((B, H), jnp.float32)   # last layer: only sent vecs
        out_specs = full((B, H))
    else:
        out_shape = jax.ShapeDtypeStruct((BS, H), jnp.bfloat16)  # bf16 inter-layer residual
        out_specs = full((BS, H))

    # Single-step grid: whole batch processed in one block (no per-step overhead, weights
    # single-resident).  At real BERT sizes reintroduce a batch/q-tile grid, mark weight
    # specs pipeline_mode=pl.Buffered(1), and raise vmem_limit_bytes on v5e/v6e.
    return pl.pallas_call(
        kernel,
        out_shape=out_shape,
        grid_spec=pltpu.PrefetchScalarGridSpec(
            num_scalar_prefetch=0,
            grid=(1,),
            in_specs=in_specs,
            out_specs=out_specs,
            scratch_shapes=[pltpu.VMEM((BS, H), jnp.float32)]),
        compiler_params=pltpu.CompilerParams(
            dimension_semantics=("arbitrary",),
            vmem_limit_bytes=48 * 1024 * 1024),
    )(*operands)


# ------------------------- synthetic BERT parameters -----------------------

def init_params(key, vocab, max_pos, hidden, heads, inter, layers):
    keys = jax.random.split(key, 4 + layers * 4)

    def w_bf16(k, shape):
        return (0.02 * jax.random.normal(k, shape, jnp.float32)).astype(jnp.bfloat16)

    p = {
        "num_heads": heads,
        "word_emb": 0.02 * jax.random.normal(keys[0], (vocab, hidden), jnp.float32),
        "pos_emb": 0.02 * jax.random.normal(keys[1], (max_pos, hidden), jnp.float32),
        "type_emb": 0.02 * jax.random.normal(keys[2], (2, hidden), jnp.float32),
        "emb_ln_g": jnp.ones((1, hidden), jnp.float32),
        "emb_ln_b": jnp.zeros((1, hidden), jnp.float32),
        "layers": [],
    }
    for l in range(layers):
        k = keys[4 + l * 4: 4 + (l + 1) * 4]
        p["layers"].append({
            # Wq | Wk | Wv fused along the output (lane) axis.
            "Wqkv": w_bf16(k[0], (hidden, 3 * hidden)),
            "bqkv": jnp.zeros((1, 3 * hidden), jnp.float32),
            "Wo": w_bf16(k[1], (hidden, hidden)),
            "bo": jnp.zeros((1, hidden), jnp.float32),
            "ln1_g": jnp.ones((1, hidden), jnp.float32),
            "ln1_b": jnp.zeros((1, hidden), jnp.float32),
            "W1": w_bf16(k[2], (hidden, inter)),
            "b1": jnp.zeros((1, inter), jnp.float32),
            "W2": w_bf16(k[3], (inter, hidden)),
            "b2": jnp.zeros((1, hidden), jnp.float32),
            "ln2_g": jnp.ones((1, hidden), jnp.float32),
            "ln2_b": jnp.zeros((1, hidden), jnp.float32),
        })
    return p


# ------------------------------- forward pass -------------------------------

def bert_vec_forward(params, ipt_ids, attn_masks):
    B, S = ipt_ids.shape
    H = params["word_emb"].shape[1]
    nH = params["num_heads"]

    # Embedding-table gathers are XLA glue; everything downstream is Pallas.
    x = (params["word_emb"][ipt_ids]
         + params["pos_emb"][:S][None, :, :]
         + params["type_emb"][0][None, None, :])                 # (B, S, H) f32
    x = x.reshape(B * S, H)                                      # lane-dense residual slab

    mask_f = attn_masks.astype(jnp.float32)
    mask_bs = mask_f                                             # (B, S)   -> key bias
    mask_sv = mask_f.reshape(B * S, 1)                           # (B*S, 1) -> masked mean

    layers = params["layers"]
    n_layers = len(layers)
    out = None
    for li, lp in enumerate(layers):
        first = li == 0
        last = li == n_layers - 1
        out = encoder_layer(
            x, mask_bs, lp, nH, batch=B, seq=S,
            in_ln=(params["emb_ln_g"], params["emb_ln_b"]) if first else None,
            mask_sv=mask_sv if last else None,
            compute_mean=last)
        if not last:
            x = out                                              # (B*S, H) bf16 residual
    return out                                                   # (B, H) f32 sent_vecs


def pad_sequence(id_lists, pad_id=102):
    """Mirror of TokenizerBasedModel.Pad_Sequence (pad with 102, attn mask 0 on pad)."""
    max_len = max(len(ids) for ids in id_lists)
    B = len(id_lists)
    ipt = [[pad_id] * max_len for _ in range(B)]
    msk = [[1] * max_len for _ in range(B)]
    for i, ids in enumerate(id_lists):
        for j, t in enumerate(ids):
            ipt[i][j] = t
        for j in range(len(ids), max_len):
            msk[i][j] = 0
    return jnp.asarray(ipt, jnp.int32), jnp.asarray(msk, jnp.int32)


# ---------------------- pure-JAX reference (numerics check) ----------------------

def _bert_vec_reference(params, ipt_ids, attn_masks):
    """XLA reference mirroring the kernel's dtype strategy (bf16 MXU inputs, f32 accum)."""
    B, S = ipt_ids.shape
    H = params["word_emb"].shape[1]
    nH = params["num_heads"]
    hd = H // nH
    f32, bf16 = jnp.float32, jnp.bfloat16

    def ln(v, g, b):
        mu = v.mean(-1, keepdims=True)
        var = ((v - mu) ** 2).mean(-1, keepdims=True)
        return (v - mu) * lax.rsqrt(var + 1e-12) * g + b

    x = (params["word_emb"][ipt_ids]
         + params["pos_emb"][:S][None, :, :]
         + params["type_emb"][0][None, None, :]).astype(f32)     # (B, S, H)
    x = ln(x, params["emb_ln_g"], params["emb_ln_b"])
    mask = attn_masks.astype(f32)                                # (B, S)
    key_bias = (1.0 - mask)[:, None, None, :] * -10000.0         # (B, 1, 1, S)

    n_layers = len(params["layers"])
    for li, lp in enumerate(params["layers"]):
        qkv = (jnp.einsum("bsh,hk->bsk", x.astype(bf16), lp["Wqkv"],
                          preferred_element_type=f32) + lp["bqkv"]).astype(bf16)
        q = qkv[..., :H].reshape(B, S, nH, hd)
        k = qkv[..., H:2 * H].reshape(B, S, nH, hd)
        v = qkv[..., 2 * H:].reshape(B, S, nH, hd)
        s = jnp.einsum("bqhd,bkhd->bhqk", q, k,
                       preferred_element_type=f32) / math.sqrt(hd) + key_bias
        p = jax.nn.softmax(s, axis=-1)
        ctx = jnp.einsum("bhqk,bkhd->bqhd", p.astype(bf16), v,
                         preferred_element_type=f32).reshape(B, S, H)
        attn = jnp.einsum("bsh,hk->bsk", ctx.astype(bf16), lp["Wo"],
                          preferred_element_type=f32) + lp["bo"]
        x = ln(x + attn, lp["ln1_g"], lp["ln1_b"])
        inter = jnp.einsum("bsh,hk->bsk", x.astype(bf16), lp["W1"],
                           preferred_element_type=f32) + lp["b1"]
        inter = _gelu_tanh(inter)
        ffn = jnp.einsum("bsh,hk->bsk", inter.astype(bf16), lp["W2"],
                         preferred_element_type=f32) + lp["b2"]
        x = ln(x + ffn, lp["ln2_g"], lp["ln2_b"])
        if li != n_layers - 1:
            x = x.astype(bf16).astype(f32)                       # mirror bf16 residual hop
    return (x * mask[..., None]).mean(axis=1)                    # (B, H)


# ----------------------------------- main -----------------------------------

if __name__ == "__main__":
    VOCAB, MAX_POS, HIDDEN, HEADS, INTER, LAYERS = 50, 16, 32, 2, 64, 2

    key = jax.random.PRNGKey(0)
    pkey, dkey = jax.random.split(key)
    params = init_params(pkey, VOCAB, MAX_POS, HIDDEN, HEADS, INTER, LAYERS)

    # Two "sentences" of pre-tokenized ids (lengths 8 and 5) -> padded to (2, 8).
    ids = jax.random.randint(dkey, (2, 8), 0, VOCAB)
    sent0 = [int(t) for t in ids[0]]
    sent1 = [int(t) for t in ids[1][:5]]
    ipt_ids, attn_masks = pad_sequence([sent0, sent1])

    sent_vecs = bert_vec_forward(params, ipt_ids, attn_masks)
    jax.block_until_ready(sent_vecs)
    assert sent_vecs.shape == (2, HIDDEN)
    assert bool(jnp.all(jnp.isfinite(sent_vecs)))

    # Numerics check vs a pure-XLA reference (approx-reciprocal softmax + bf16 residual
    # hops account for the tolerance).
    ref = _bert_vec_reference(params, ipt_ids, attn_masks)
    err = float(jnp.max(jnp.abs(sent_vecs - ref)))
    assert err < 2e-2, f"max abs err vs reference: {err}"

    print("KERNEL_OK")
</pallas_src>

<mosaic_0001>
module attributes {stable_mosaic.version = 11 : i64} {
  func.func @_encoder_layer_kernel(%arg0: i32, %arg1: memref<16x32xf32, #tpu.memory_space<vmem>>, %arg2: memref<2x8xf32, #tpu.memory_space<vmem>>, %arg3: memref<1x32xf32, #tpu.memory_space<vmem>>, %arg4: memref<1x32xf32, #tpu.memory_space<vmem>>, %arg5: memref<32x96xbf16, #tpu.memory_space<vmem>>, %arg6: memref<1x96xf32, #tpu.memory_space<vmem>>, %arg7: memref<32x32xbf16, #tpu.memory_space<vmem>>, %arg8: memref<1x32xf32, #tpu.memory_space<vmem>>, %arg9: memref<1x32xf32, #tpu.memory_space<vmem>>, %arg10: memref<1x32xf32, #tpu.memory_space<vmem>>, %arg11: memref<32x64xbf16, #tpu.memory_space<vmem>>, %arg12: memref<1x64xf32, #tpu.memory_space<vmem>>, %arg13: memref<64x32xbf16, #tpu.memory_space<vmem>>, %arg14: memref<1x32xf32, #tpu.memory_space<vmem>>, %arg15: memref<1x32xf32, #tpu.memory_space<vmem>>, %arg16: memref<1x32xf32, #tpu.memory_space<vmem>>, %arg17: memref<16x32xbf16, #tpu.memory_space<vmem>>, %arg18: memref<16x32xf32, #tpu.memory_space<vmem>>) attributes {dimension_semantics = [#tpu.dimension_semantics<arbitrary>], iteration_bounds = array<i64: 1>, scalar_prefetch = 0 : i64, scratch_operands = 1 : i64, tpu.core_type = #tpu.core_type<tc>, window_params = [{pipeline_mode = #tpu.pipeline_mode<synchronous>, transform_indices = @transform_0, window_bounds = array<i64: 16, 32>}, {pipeline_mode = #tpu.pipeline_mode<synchronous>, transform_indices = @transform_1, window_bounds = array<i64: 2, 8>}, {pipeline_mode = #tpu.pipeline_mode<synchronous>, transform_indices = @transform_2, window_bounds = array<i64: 1, 32>}, {pipeline_mode = #tpu.pipeline_mode<synchronous>, transform_indices = @transform_3, window_bounds = array<i64: 1, 32>}, {pipeline_mode = #tpu.pipeline_mode<synchronous>, transform_indices = @transform_4, window_bounds = array<i64: 32, 96>}, {pipeline_mode = #tpu.pipeline_mode<synchronous>, transform_indices = @transform_5, window_bounds = array<i64: 1, 96>}, {pipeline_mode = #tpu.pipeline_mode<synchronous>, transform_indices = @transform_6, window_bounds = array<i64: 32, 32>}, {pipeline_mode = #tpu.pipeline_mode<synchronous>, transform_indices = @transform_7, window_bounds = array<i64: 1, 32>}, {pipeline_mode = #tpu.pipeline_mode<synchronous>, transform_indices = @transform_8, window_bounds = array<i64: 1, 32>}, {pipeline_mode = #tpu.pipeline_mode<synchronous>, transform_indices = @transform_9, window_bounds = array<i64: 1, 32>}, {pipeline_mode = #tpu.pipeline_mode<synchronous>, transform_indices = @transform_10, window_bounds = array<i64: 32, 64>}, {pipeline_mode = #tpu.pipeline_mode<synchronous>, transform_indices = @transform_11, window_bounds = array<i64: 1, 64>}, {pipeline_mode = #tpu.pipeline_mode<synchronous>, transform_indices = @transform_12, window_bounds = array<i64: 64, 32>}, {pipeline_mode = #tpu.pipeline_mode<synchronous>, transform_indices = @transform_13, window_bounds = array<i64: 1, 32>}, {pipeline_mode = #tpu.pipeline_mode<synchronous>, transform_indices = @transform_14, window_bounds = array<i64: 1, 32>}, {pipeline_mode = #tpu.pipeline_mode<synchronous>, transform_indices = @transform_15, window_bounds = array<i64: 1, 32>}, {pipeline_mode = #tpu.pipeline_mode<synchronous>, transform_indices = @transform_16, window_bounds = array<i64: 16, 32>}]} {
    %c0 = arith.constant 0 : index
    %c0_0 = arith.constant 0 : index
    %0 = vector.load %arg1[%c0, %c0_0] : memref<16x32xf32, #tpu.memory_space<vmem>>, vector<16x32xf32>
    %c0_1 = arith.constant 0 : index
    %c0_2 = arith.constant 0 : index
    %1 = vector.load %arg3[%c0_1, %c0_2] : memref<1x32xf32, #tpu.memory_space<vmem>>, vector<1x32xf32>
    %c0_3 = arith.constant 0 : index
    %c0_4 = arith.constant 0 : index
    %2 = vector.load %arg4[%c0_3, %c0_4] : memref<1x32xf32, #tpu.memory_space<vmem>>, vector<1x32xf32>
    %cst = arith.constant dense<0.000000e+00> : vector<16xf32>
    %3 = vector.multi_reduction <add>, %0, %cst [1] : vector<16x32xf32> to vector<16xf32>
    %4 = vector.shape_cast %3 : vector<16xf32> to vector<16x1xf32>
    %cst_5 = arith.constant 3.200000e+01 : f32
    %5 = vector.broadcast %cst_5 : f32 to vector<16x1xf32>
    %6 = arith.divf %4, %5 : vector<16x1xf32>
    %7 = vector.broadcast %6 : vector<16x1xf32> to vector<16x32xf32>
    %8 = arith.subf %0, %7 : vector<16x32xf32>
    %9 = arith.mulf %8, %8 : vector<16x32xf32>
    %cst_6 = arith.constant dense<0.000000e+00> : vector<16xf32>
    %10 = vector.multi_reduction <add>, %9, %cst_6 [1] : vector<16x32xf32> to vector<16xf32>
    %11 = vector.shape_cast %10 : vector<16xf32> to vector<16x1xf32>
    %cst_7 = arith.constant 3.200000e+01 : f32
    %12 = vector.broadcast %cst_7 : f32 to vector<16x1xf32>
    %13 = arith.divf %11, %12 : vector<16x1xf32>
    %14 = vector.broadcast %6 : vector<16x1xf32> to vector<16x32xf32>
    %15 = arith.subf %0, %14 : vector<16x32xf32>
    %cst_8 = arith.constant 9.99999996E-13 : f32
    %16 = vector.broadcast %cst_8 : f32 to vector<16x1xf32>
    %17 = arith.addf %13, %16 : vector<16x1xf32>
    %18 = math.rsqrt %17 : vector<16x1xf32>
    %19 = vector.broadcast %18 : vector<16x1xf32> to vector<16x32xf32>
    %20 = arith.mulf %15, %19 : vector<16x32xf32>
    %21 = vector.broadcast %1 : vector<1x32xf32> to vector<16x32xf32>
    %22 = arith.mulf %20, %21 : vector<16x32xf32>
    %23 = vector.broadcast %2 : vector<1x32xf32> to vector<16x32xf32>
    %24 = arith.addf %22, %23 : vector<16x32xf32>
    %c0_9 = arith.constant 0 : index
    %c0_10 = arith.constant 0 : index
    %25 = vector.load %arg2[%c0_9, %c0_10] : memref<2x8xf32, #tpu.memory_space<vmem>>, vector<2x8xf32>
    %cst_11 = arith.constant 1.000000e+00 : f32
    %26 = vector.broadcast %cst_11 : f32 to vector<2x8xf32>
    %27 = arith.subf %26, %25 : vector<2x8xf32>
    %cst_12 = arith.constant -1.000000e+04 : f32
    %28 = vector.broadcast %cst_12 : f32 to vector<2x8xf32>
    %29 = arith.mulf %27, %28 : vector<2x8xf32>
    %30 = arith.truncf %24 : vector<16x32xf32> to vector<16x32xbf16>
    %c0_13 = arith.constant 0 : index
    %c0_14 = arith.constant 0 : index
    %31 = vector.load %arg5[%c0_13, %c0_14] : memref<32x96xbf16, #tpu.memory_space<vmem>>, vector<32x96xbf16>
    %cst_15 = arith.constant dense<0.000000e+00> : vector<16x96xf32>
    %32 = tpu.matmul %30, %31, %cst_15 {dimension_numbers = #tpu.dot_dimension_numbers<[1], [0], [0], [1], [0, 0, 1, 1], [], []>} : vector<16x32xbf16>, vector<32x96xbf16>, vector<16x96xf32> -> vector<16x96xf32>
    %c0_16 = arith.constant 0 : index
    %c0_17 = arith.constant 0 : index
    %33 = vector.load %arg6[%c0_16, %c0_17] : memref<1x96xf32, #tpu.memory_space<vmem>>, vector<1x96xf32>
    %34 = vector.broadcast %33 : vector<1x96xf32> to vector<16x96xf32>
    %35 = arith.addf %32, %34 : vector<16x96xf32>
    %36 = arith.truncf %35 : vector<16x96xf32> to vector<16x96xbf16>
    %37 = vector.extract_strided_slice %29 {offsets = [0, 0], sizes = [1, 8], strides = [1, 1]} : vector<2x8xf32> to vector<1x8xf32>
    %38 = vector.extract_strided_slice %36 {offsets = [0, 0], sizes = [8, 16], strides = [1, 1]} : vector<16x96xbf16> to vector<8x16xbf16>
    %39 = vector.extract_strided_slice %36 {offsets = [0, 32], sizes = [8, 16], strides = [1, 1]} : vector<16x96xbf16> to vector<8x16xbf16>
    %40 = vector.extract_strided_slice %36 {offsets = [0, 64], sizes = [8, 16], strides = [1, 1]} : vector<16x96xbf16> to vector<8x16xbf16>
    %cst_18 = arith.constant dense<0.000000e+00> : vector<8x8xf32>
    %41 = tpu.matmul %38, %39, %cst_18 {dimension_numbers = #tpu.dot_dimension_numbers<[1], [1], [0], [0], [0, 0, 1, 0], [], []>} : vector<8x16xbf16>, vector<8x16xbf16>, vector<8x8xf32> -> vector<8x8xf32>
    %cst_19 = arith.constant 2.500000e-01 : f32
    %42 = vector.broadcast %cst_19 : f32 to vector<8x8xf32>
    %43 = arith.mulf %41, %42 : vector<8x8xf32>
    %44 = vector.broadcast %37 : vector<1x8xf32> to vector<8x8xf32>
    %45 = arith.addf %43, %44 : vector<8x8xf32>
    %cst_20 = arith.constant dense<0xFF800000> : vector<8xf32>
    %46 = vector.multi_reduction <maximumf>, %45, %cst_20 [1] : vector<8x8xf32> to vector<8xf32>
    %47 = vector.shape_cast %46 : vector<8xf32> to vector<8x1xf32>
    %48 = vector.broadcast %47 : vector<8x1xf32> to vector<8x8xf32>
    %49 = arith.subf %45, %48 : vector<8x8xf32>
    %50 = math.exp %49 : vector<8x8xf32>
    %cst_21 = arith.constant dense<0.000000e+00> : vector<8xf32>
    %51 = vector.multi_reduction <add>, %50, %cst_21 [1] : vector<8x8xf32> to vector<8xf32>
    %52 = vector.shape_cast %51 : vector<8xf32> to vector<8x1xf32>
    %53 = tpu.reciprocal %52 {approx = true} : vector<8x1xf32> -> vector<8x1xf32>
    %54 = vector.broadcast %53 : vector<8x1xf32> to vector<8x8xf32>
    %55 = arith.mulf %50, %54 : vector<8x8xf32>
    %56 = arith.truncf %55 : vector<8x8xf32> to vector<8x8xbf16>
    %cst_22 = arith.constant dense<0.000000e+00> : vector<8x16xf32>
    %57 = tpu.matmul %56, %40, %cst_22 {dimension_numbers = #tpu.dot_dimension_numbers<[1], [0], [0], [1], [0, 0, 1, 1], [], []>} : vector<8x8xbf16>, vector<8x16xbf16>, vector<8x16xf32> -> vector<8x16xf32>
    %c0_23 = arith.constant 0 : index
    %c0_24 = arith.constant 0 : index
    %58 = vector.load %arg18[%c0_23, %c0_24] : memref<16x32xf32, #tpu.memory_space<vmem>>, vector<8x16xf32>
    tpu.vector_store %arg18[%c0_23, %c0_24], %57 {strides = array<i32>} : memref<16x32xf32, #tpu.memory_space<vmem>>, vector<8x16xf32>,
    %59 = vector.extract_strided_slice %36 {offsets = [0, 16], sizes = [8, 16], strides = [1, 1]} : vector<16x96xbf16> to vector<8x16xbf16>
    %60 = vector.extract_strided_slice %36 {offsets = [0, 48], sizes = [8, 16], strides = [1, 1]} : vector<16x96xbf16> to vector<8x16xbf16>
    %61 = vector.extract_strided_slice %36 {offsets = [0, 80], sizes = [8, 16], strides = [1, 1]} : vector<16x96xbf16> to vector<8x16xbf16>
    %cst_25 = arith.constant dense<0.000000e+00> : vector<8x8xf32>
    %62 = tpu.matmul %59, %60, %cst_25 {dimension_numbers = #tpu.dot_dimension_numbers<[1], [1], [0], [0], [0, 0, 1, 0], [], []>} : vector<8x16xbf16>, vector<8x16xbf16>, vector<8x8xf32> -> vector<8x8xf32>
    %cst_26 = arith.constant 2.500000e-01 : f32
    %63 = vector.broadcast %cst_26 : f32 to vector<8x8xf32>
    %64 = arith.mulf %62, %63 : vector<8x8xf32>
    %65 = vector.broadcast %37 : vector<1x8xf32> to vector<8x8xf32>
    %66 = arith.addf %64, %65 : vector<8x8xf32>
    %cst_27 = arith.constant dense<0xFF800000> : vector<8xf32>
    %67 = vector.multi_reduction <maximumf>, %66, %cst_27 [1] : vector<8x8xf32> to vector<8xf32>
    %68 = vector.shape_cast %67 : vector<8xf32> to vector<8x1xf32>
    %69 = vector.broadcast %68 : vector<8x1xf32> to vector<8x8xf32>
    %70 = arith.subf %66, %69 : vector<8x8xf32>
    %71 = math.exp %70 : vector<8x8xf32>
    %cst_28 = arith.constant dense<0.000000e+00> : vector<8xf32>
    %72 = vector.multi_reduction <add>, %71, %cst_28 [1] : vector<8x8xf32> to vector<8xf32>
    %73 = vector.shape_cast %72 : vector<8xf32> to vector<8x1xf32>
    %74 = tpu.reciprocal %73 {approx = true} : vector<8x1xf32> -> vector<8x1xf32>
    %75 = vector.broadcast %74 : vector<8x1xf32> to vector<8x8xf32>
    %76 = arith.mulf %71, %75 : vector<8x8xf32>
    %77 = arith.truncf %76 : vector<8x8xf32> to vector<8x8xbf16>
    %cst_29 = arith.constant dense<0.000000e+00> : vector<8x16xf32>
    %78 = tpu.matmul %77, %61, %cst_29 {dimension_numbers = #tpu.dot_dimension_numbers<[1], [0], [0], [1], [0, 0, 1, 1], [], []>} : vector<8x8xbf16>, vector<8x16xbf16>, vector<8x16xf32> -> vector<8x16xf32>
    %c0_30 = arith.constant 0 : index
    %c16 = arith.constant 16 : index
    %79 = vector.load %arg18[%c0_30, %c16] : memref<16x32xf32, #tpu.memory_space<vmem>>, vector<8x16xf32>
    tpu.vector_store %arg18[%c0_30, %c16], %78 {strides = array<i32>} : memref<16x32xf32, #tpu.memory_space<vmem>>, vector<8x16xf32>,
    %80 = vector.extract_strided_slice %29 {offsets = [1, 0], sizes = [1, 8], strides = [1, 1]} : vector<2x8xf32> to vector<1x8xf32>
    %81 = vector.extract_strided_slice %36 {offsets = [8, 0], sizes = [8, 16], strides = [1, 1]} : vector<16x96xbf16> to vector<8x16xbf16>
    %82 = vector.extract_strided_slice %36 {offsets = [8, 32], sizes = [8, 16], strides = [1, 1]} : vector<16x96xbf16> to vector<8x16xbf16>
    %83 = vector.extract_strided_slice %36 {offsets = [8, 64], sizes = [8, 16], strides = [1, 1]} : vector<16x96xbf16> to vector<8x16xbf16>
    %cst_31 = arith.constant dense<0.000000e+00> : vector<8x8xf32>
    %84 = tpu.matmul %81, %82, %cst_31 {dimension_numbers = #tpu.dot_dimension_numbers<[1], [1], [0], [0], [0, 0, 1, 0], [], []>} : vector<8x16xbf16>, vector<8x16xbf16>, vector<8x8xf32> -> vector<8x8xf32>
    %cst_32 = arith.constant 2.500000e-01 : f32
    %85 = vector.broadcast %cst_32 : f32 to vector<8x8xf32>
    %86 = arith.mulf %84, %85 : vector<8x8xf32>
    %87 = vector.broadcast %80 : vector<1x8xf32> to vector<8x8xf32>
    %88 = arith.addf %86, %87 : vector<8x8xf32>
    %cst_33 = arith.constant dense<0xFF800000> : vector<8xf32>
    %89 = vector.multi_reduction <maximumf>, %88, %cst_33 [1] : vector<8x8xf32> to vector<8xf32>
    %90 = vector.shape_cast %89 : vector<8xf32> to vector<8x1xf32>
    %91 = vector.broadcast %90 : vector<8x1xf32> to vector<8x8xf32>
    %92 = arith.subf %88, %91 : vector<8x8xf32>
    %93 = math.exp %92 : vector<8x8xf32>
    %cst_34 = arith.constant dense<0.000000e+00> : vector<8xf32>
    %94 = vector.multi_reduction <add>, %93, %cst_34 [1] : vector<8x8xf32> to vector<8xf32>
    %95 = vector.shape_cast %94 : vector<8xf32> to vector<8x1xf32>
    %96 = tpu.reciprocal %95 {approx = true} : vector<8x1xf32> -> vector<8x1xf32>
    %97 = vector.broadcast %96 : vector<8x1xf32> to vector<8x8xf32>
    %98 = arith.mulf %93, %97 : vector<8x8xf32>
    %99 = arith.truncf %98 : vector<8x8xf32> to vector<8x8xbf16>
    %cst_35 = arith.constant dense<0.000000e+00> : vector<8x16xf32>
    %100 = tpu.matmul %99, %83, %cst_35 {dimension_numbers = #tpu.dot_dimension_numbers<[1], [0], [0], [1], [0, 0, 1, 1], [], []>} : vector<8x8xbf16>, vector<8x16xbf16>, vector<8x16xf32> -> vector<8x16xf32>
    %c8 = arith.constant 8 : index
    %c0_36 = arith.constant 0 : index
    %101 = vector.load %arg18[%c8, %c0_36] : memref<16x32xf32, #tpu.memory_space<vmem>>, vector<8x16xf32>
    tpu.vector_store %arg18[%c8, %c0_36], %100 {strides = array<i32>} : memref<16x32xf32, #tpu.memory_space<vmem>>, vector<8x16xf32>,
    %102 = vector.extract_strided_slice %36 {offsets = [8, 16], sizes = [8, 16], strides = [1, 1]} : vector<16x96xbf16> to vector<8x16xbf16>
    %103 = vector.extract_strided_slice %36 {offsets = [8, 48], sizes = [8, 16], strides = [1, 1]} : vector<16x96xbf16> to vector<8x16xbf16>
    %104 = vector.extract_strided_slice %36 {offsets = [8, 80], sizes = [8, 16], strides = [1, 1]} : vector<16x96xbf16> to vector<8x16xbf16>
    %cst_37 = arith.constant dense<0.000000e+00> : vector<8x8xf32>
    %105 = tpu.matmul %102, %103, %cst_37 {dimension_numbers = #tpu.dot_dimension_numbers<[1], [1], [0], [0], [0, 0, 1, 0], [], []>} : vector<8x16xbf16>, vector<8x16xbf16>, vector<8x8xf32> -> vector<8x8xf32>
    %cst_38 = arith.constant 2.500000e-01 : f32
    %106 = vector.broadcast %cst_38 : f32 to vector<8x8xf32>
    %107 = arith.mulf %105, %106 : vector<8x8xf32>
    %108 = vector.broadcast %80 : vector<1x8xf32> to vector<8x8xf32>
    %109 = arith.addf %107, %108 : vector<8x8xf32>
    %cst_39 = arith.constant dense<0xFF800000> : vector<8xf32>
    %110 = vector.multi_reduction <maximumf>, %109, %cst_39 [1] : vector<8x8xf32> to vector<8xf32>
    %111 = vector.shape_cast %110 : vector<8xf32> to vector<8x1xf32>
    %112 = vector.broadcast %111 : vector<8x1xf32> to vector<8x8xf32>
    %113 = arith.subf %109, %112 : vector<8x8xf32>
    %114 = math.exp %113 : vector<8x8xf32>
    %cst_40 = arith.constant dense<0.000000e+00> : vector<8xf32>
    %115 = vector.multi_reduction <add>, %114, %cst_40 [1] : vector<8x8xf32> to vector<8xf32>
    %116 = vector.shape_cast %115 : vector<8xf32> to vector<8x1xf32>
    %117 = tpu.reciprocal %116 {approx = true} : vector<8x1xf32> -> vector<8x1xf32>
    %118 = vector.broadcast %117 : vector<8x1xf32> to vector<8x8xf32>
    %119 = arith.mulf %114, %118 : vector<8x8xf32>
    %120 = arith.truncf %119 : vector<8x8xf32> to vector<8x8xbf16>
    %cst_41 = arith.constant dense<0.000000e+00> : vector<8x16xf32>
    %121 = tpu.matmul %120, %104, %cst_41 {dimension_numbers = #tpu.dot_dimension_numbers<[1], [0], [0], [1], [0, 0, 1, 1], [], []>} : vector<8x8xbf16>, vector<8x16xbf16>, vector<8x16xf32> -> vector<8x16xf32>
    %c8_42 = arith.constant 8 : index
    %c16_43 = arith.constant 16 : index
    %122 = vector.load %arg18[%c8_42, %c16_43] : memref<16x32xf32, #tpu.memory_space<vmem>>, vector<8x16xf32>
    tpu.vector_store %arg18[%c8_42, %c16_43], %121 {strides = array<i32>} : memref<16x32xf32, #tpu.memory_space<vmem>>, vector<8x16xf32>,
    %c0_44 = arith.constant 0 : index
    %c0_45 = arith.constant 0 : index
    %123 = vector.load %arg18[%c0_44, %c0_45] : memref<16x32xf32, #tpu.memory_space<vmem>>, vector<16x32xf32>
    %124 = arith.truncf %123 : vector<16x32xf32> to vector<16x32xbf16>
    %c0_46 = arith.constant 0 : index
    %c0_47 = arith.constant 0 : index
    %125 = vector.load %arg7[%c0_46, %c0_47] : memref<32x32xbf16, #tpu.memory_space<vmem>>, vector<32x32xbf16>
    %cst_48 = arith.constant dense<0.000000e+00> : vector<16x32xf32>
    %126 = tpu.matmul %124, %125, %cst_48 {dimension_numbers = #tpu.dot_dimension_numbers<[1], [0], [0], [1], [0, 0, 1, 1], [], []>} : vector<16x32xbf16>, vector<32x32xbf16>, vector<16x32xf32> -> vector<16x32xf32>
    %c0_49 = arith.constant 0 : index
    %c0_50 = arith.constant 0 : index
    %127 = vector.load %arg8[%c0_49, %c0_50] : memref<1x32xf32, #tpu.memory_space<vmem>>, vector<1x32xf32>
    %128 = vector.broadcast %127 : vector<1x32xf32> to vector<16x32xf32>
    %129 = arith.addf %126, %128 : vector<16x32xf32>
    %130 = arith.addf %24, %129 : vector<16x32xf32>
    %c0_51 = arith.constant 0 : index
    %c0_52 = arith.constant 0 : index
    %131 = vector.load %arg9[%c0_51, %c0_52] : memref<1x32xf32, #tpu.memory_space<vmem>>, vector<1x32xf32>
    %c0_53 = arith.constant 0 : index
    %c0_54 = arith.constant 0 : index
    %132 = vector.load %arg10[%c0_53, %c0_54] : memref<1x32xf32, #tpu.memory_space<vmem>>, vector<1x32xf32>
    %cst_55 = arith.constant dense<0.000000e+00> : vector<16xf32>
    %133 = vector.multi_reduction <add>, %130, %cst_55 [1] : vector<16x32xf32> to vector<16xf32>
    %134 = vector.shape_cast %133 : vector<16xf32> to vector<16x1xf32>
    %cst_56 = arith.constant 3.200000e+01 : f32
    %135 = vector.broadcast %cst_56 : f32 to vector<16x1xf32>
    %136 = arith.divf %134, %135 : vector<16x1xf32>
    %137 = vector.broadcast %136 : vector<16x1xf32> to vector<16x32xf32>
    %138 = arith.subf %130, %137 : vector<16x32xf32>
    %139 = arith.mulf %138, %138 : vector<16x32xf32>
    %cst_57 = arith.constant dense<0.000000e+00> : vector<16xf32>
    %140 = vector.multi_reduction <add>, %139, %cst_57 [1] : vector<16x32xf32> to vector<16xf32>
    %141 = vector.shape_cast %140 : vector<16xf32> to vector<16x1xf32>
    %cst_58 = arith.constant 3.200000e+01 : f32
    %142 = vector.broadcast %cst_58 : f32 to vector<16x1xf32>
    %143 = arith.divf %141, %142 : vector<16x1xf32>
    %144 = vector.broadcast %136 : vector<16x1xf32> to vector<16x32xf32>
    %145 = arith.subf %130, %144 : vector<16x32xf32>
    %cst_59 = arith.constant 9.99999996E-13 : f32
    %146 = vector.broadcast %cst_59 : f32 to vector<16x1xf32>
    %147 = arith.addf %143, %146 : vector<16x1xf32>
    %148 = math.rsqrt %147 : vector<16x1xf32>
    %149 = vector.broadcast %148 : vector<16x1xf32> to vector<16x32xf32>
    %150 = arith.mulf %145, %149 : vector<16x32xf32>
    %151 = vector.broadcast %131 : vector<1x32xf32> to vector<16x32xf32>
    %152 = arith.mulf %150, %151 : vector<16x32xf32>
    %153 = vector.broadcast %132 : vector<1x32xf32> to vector<16x32xf32>
    %154 = arith.addf %152, %153 : vector<16x32xf32>
    %155 = arith.truncf %154 : vector<16x32xf32> to vector<16x32xbf16>
    %c0_60 = arith.constant 0 : index
    %c0_61 = arith.constant 0 : index
    %156 = vector.load %arg11[%c0_60, %c0_61] : memref<32x64xbf16, #tpu.memory_space<vmem>>, vector<32x64xbf16>
    %cst_62 = arith.constant dense<0.000000e+00> : vector<16x64xf32>
    %157 = tpu.matmul %155, %156, %cst_62 {dimension_numbers = #tpu.dot_dimension_numbers<[1], [0], [0], [1], [0, 0, 1, 1], [], []>} : vector<16x32xbf16>, vector<32x64xbf16>, vector<16x64xf32> -> vector<16x64xf32>
    %c0_63 = arith.constant 0 : index
    %c0_64 = arith.constant 0 : index
    %158 = vector.load %arg12[%c0_63, %c0_64] : memref<1x64xf32, #tpu.memory_space<vmem>>, vector<1x64xf32>
    %159 = vector.broadcast %158 : vector<1x64xf32> to vector<16x64xf32>
    %160 = arith.addf %157, %159 : vector<16x64xf32>
    %cst_65 = arith.constant 5.000000e-01 : f32
    %161 = vector.broadcast %cst_65 : f32 to vector<16x64xf32>
    %162 = arith.mulf %161, %160 : vector<16x64xf32>
    %cst_66 = arith.constant 4.471500e-02 : f32
    %163 = vector.broadcast %cst_66 : f32 to vector<16x64xf32>
    %164 = arith.mulf %163, %160 : vector<16x64xf32>
    %165 = arith.mulf %164, %160 : vector<16x64xf32>
    %166 = arith.mulf %165, %160 : vector<16x64xf32>
    %167 = arith.addf %160, %166 : vector<16x64xf32>
    %cst_67 = arith.constant 0.797884583 : f32
    %168 = vector.broadcast %cst_67 : f32 to vector<16x64xf32>
    %169 = arith.mulf %168, %167 : vector<16x64xf32>
    %170 = math.tanh %169 : vector<16x64xf32>
    %cst_68 = arith.constant 1.000000e+00 : f32
    %171 = vector.broadcast %cst_68 : f32 to vector<16x64xf32>
    %172 = arith.addf %171, %170 : vector<16x64xf32>
    %173 = arith.mulf %162, %172 : vector<16x64xf32>
    %174 = arith.truncf %173 : vector<16x64xf32> to vector<16x64xbf16>
    %c0_69 = arith.constant 0 : index
    %c0_70 = arith.constant 0 : index
    %175 = vector.load %arg13[%c0_69, %c0_70] : memref<64x32xbf16, #tpu.memory_space<vmem>>, vector<64x32xbf16>
    %cst_71 = arith.constant dense<0.000000e+00> : vector<16x32xf32>
    %176 = tpu.matmul %174, %175, %cst_71 {dimension_numbers = #tpu.dot_dimension_numbers<[1], [0], [0], [1], [0, 0, 1, 1], [], []>} : vector<16x64xbf16>, vector<64x32xbf16>, vector<16x32xf32> -> vector<16x32xf32>
    %c0_72 = arith.constant 0 : index
    %c0_73 = arith.constant 0 : index
    %177 = vector.load %arg14[%c0_72, %c0_73] : memref<1x32xf32, #tpu.memory_space<vmem>>, vector<1x32xf32>
    %178 = vector.broadcast %177 : vector<1x32xf32> to vector<16x32xf32>
    %179 = arith.addf %176, %178 : vector<16x32xf32>
    %180 = arith.addf %154, %179 : vector<16x32xf32>
    %c0_74 = arith.constant 0 : index
    %c0_75 = arith.constant 0 : index
    %181 = vector.load %arg15[%c0_74, %c0_75] : memref<1x32xf32, #tpu.memory_space<vmem>>, vector<1x32xf32>
    %c0_76 = arith.constant 0 : index
    %c0_77 = arith.constant 0 : index
    %182 = vector.load %arg16[%c0_76, %c0_77] : memref<1x32xf32, #tpu.memory_space<vmem>>, vector<1x32xf32>
    %cst_78 = arith.constant dense<0.000000e+00> : vector<16xf32>
    %183 = vector.multi_reduction <add>, %180, %cst_78 [1] : vector<16x32xf32> to vector<16xf32>
    %184 = vector.shape_cast %183 : vector<16xf32> to vector<16x1xf32>
    %cst_79 = arith.constant 3.200000e+01 : f32
    %185 = vector.broadcast %cst_79 : f32 to vector<16x1xf32>
    %186 = arith.divf %184, %185 : vector<16x1xf32>
    %187 = vector.broadcast %186 : vector<16x1xf32> to vector<16x32xf32>
    %188 = arith.subf %180, %187 : vector<16x32xf32>
    %189 = arith.mulf %188, %188 : vector<16x32xf32>
    %cst_80 = arith.constant dense<0.000000e+00> : vector<16xf32>
    %190 = vector.multi_reduction <add>, %189, %cst_80 [1] : vector<16x32xf32> to vector<16xf32>
    %191 = vector.shape_cast %190 : vector<16xf32> to vector<16x1xf32>
    %cst_81 = arith.constant 3.200000e+01 : f32
    %192 = vector.broadcast %cst_81 : f32 to vector<16x1xf32>
    %193 = arith.divf %191, %192 : vector<16x1xf32>
    %194 = vector.broadcast %186 : vector<16x1xf32> to vector<16x32xf32>
    %195 = arith.subf %180, %194 : vector<16x32xf32>
    %cst_82 = arith.constant 9.99999996E-13 : f32
    %196 = vector.broadcast %cst_82 : f32 to vector<16x1xf32>
    %197 = arith.addf %193, %196 : vector<16x1xf32>
    %198 = math.rsqrt %197 : vector<16x1xf32>
    %199 = vector.broadcast %198 : vector<16x1xf32> to vector<16x32xf32>
    %200 = arith.mulf %195, %199 : vector<16x32xf32>
    %201 = vector.broadcast %181 : vector<1x32xf32> to vector<16x32xf32>
    %202 = arith.mulf %200, %201 : vector<16x32xf32>
    %203 = vector.broadcast %182 : vector<1x32xf32> to vector<16x32xf32>
    %204 = arith.addf %202, %203 : vector<16x32xf32>
    %205 = arith.truncf %204 : vector<16x32xf32> to vector<16x32xbf16>
    %c0_83 = arith.constant 0 : index
    %c0_84 = arith.constant 0 : index
    %206 = vector.load %arg17[%c0_83, %c0_84] : memref<16x32xbf16, #tpu.memory_space<vmem>>, vector<16x32xbf16>
    tpu.vector_store %arg17[%c0_83, %c0_84], %205 {strides = array<i32>} : memref<16x32xbf16, #tpu.memory_space<vmem>>, vector<16x32xbf16>,
    return
  }
  func.func @transform_0(%arg0: i32) -> (i32, i32) {
    %c0_i32 = arith.constant 0 : i32
    %c0_i32_0 = arith.constant 0 : i32
    %c0_i32_1 = arith.constant 0 : i32
    return %c0_i32, %c0_i32_0 : i32, i32
  }
  func.func @transform_1(%arg0: i32) -> (i32, i32) {
    %c0_i32 = arith.constant 0 : i32
    %c0_i32_0 = arith.constant 0 : i32
    %c0_i32_1 = arith.constant 0 : i32
    return %c0_i32, %c0_i32_0 : i32, i32
  }
  func.func @transform_2(%arg0: i32) -> (i32, i32) {
    %c0_i32 = arith.constant 0 : i32
    %c0_i32_0 = arith.constant 0 : i32
    %c0_i32_1 = arith.constant 0 : i32
    return %c0_i32, %c0_i32_0 : i32, i32
  }
  func.func @transform_3(%arg0: i32) -> (i32, i32) {
    %c0_i32 = arith.constant 0 : i32
    %c0_i32_0 = arith.constant 0 : i32
    %c0_i32_1 = arith.constant 0 : i32
    return %c0_i32, %c0_i32_0 : i32, i32
  }
  func.func @transform_4(%arg0: i32) -> (i32, i32) {
    %c0_i32 = arith.constant 0 : i32
    %c0_i32_0 = arith.constant 0 : i32
    %c0_i32_1 = arith.constant 0 : i32
    return %c0_i32, %c0_i32_0 : i32, i32
  }
  func.func @transform_5(%arg0: i32) -> (i32, i32) {
    %c0_i32 = arith.constant 0 : i32
    %c0_i32_0 = arith.constant 0 : i32
    %c0_i32_1 = arith.constant 0 : i32
    return %c0_i32, %c0_i32_0 : i32, i32
  }
  func.func @transform_6(%arg0: i32) -> (i32, i32) {
    %c0_i32 = arith.constant 0 : i32
    %c0_i32_0 = arith.constant 0 : i32
    %c0_i32_1 = arith.constant 0 : i32
    return %c0_i32, %c0_i32_0 : i32, i32
  }
  func.func @transform_7(%arg0: i32) -> (i32, i32) {
    %c0_i32 = arith.constant 0 : i32
    %c0_i32_0 = arith.constant 0 : i32
    %c0_i32_1 = arith.constant 0 : i32
    return %c0_i32, %c0_i32_0 : i32, i32
  }
  func.func @transform_8(%arg0: i32) -> (i32, i32) {
    %c0_i32 = arith.constant 0 : i32
    %c0_i32_0 = arith.constant 0 : i32
    %c0_i32_1 = arith.constant 0 : i32
    return %c0_i32, %c0_i32_0 : i32, i32
  }
  func.func @transform_9(%arg0: i32) -> (i32, i32) {
    %c0_i32 = arith.constant 0 : i32
    %c0_i32_0 = arith.constant 0 : i32
    %c0_i32_1 = arith.constant 0 : i32
    return %c0_i32, %c0_i32_0 : i32, i32
  }
  func.func @transform_10(%arg0: i32) -> (i32, i32) {
    %c0_i32 = arith.constant 0 : i32
    %c0_i32_0 = arith.constant 0 : i32
    %c0_i32_1 = arith.constant 0 : i32
    return %c0_i32, %c0_i32_0 : i32, i32
  }
  func.func @transform_11(%arg0: i32) -> (i32, i32) {
    %c0_i32 = arith.constant 0 : i32
    %c0_i32_0 = arith.constant 0 : i32
    %c0_i32_1 = arith.constant 0 : i32
    return %c0_i32, %c0_i32_0 : i32, i32
  }
  func.func @transform_12(%arg0: i32) -> (i32, i32) {
    %c0_i32 = arith.constant 0 : i32
    %c0_i32_0 = arith.constant 0 : i32
    %c0_i32_1 = arith.constant 0 : i32
    return %c0_i32, %c0_i32_0 : i32, i32
  }
  func.func @transform_13(%arg0: i32) -> (i32, i32) {
    %c0_i32 = arith.constant 0 : i32
    %c0_i32_0 = arith.constant 0 : i32
    %c0_i32_1 = arith.constant 0 : i32
    return %c0_i32, %c0_i32_0 : i32, i32
  }
  func.func @transform_14(%arg0: i32) -> (i32, i32) {
    %c0_i32 = arith.constant 0 : i32
    %c0_i32_0 = arith.constant 0 : i32
    %c0_i32_1 = arith.constant 0 : i32
    return %c0_i32, %c0_i32_0 : i32, i32
  }
  func.func @transform_15(%arg0: i32) -> (i32, i32) {
    %c0_i32 = arith.constant 0 : i32
    %c0_i32_0 = arith.constant 0 : i32
    %c0_i32_1 = arith.constant 0 : i32
    return %c0_i32, %c0_i32_0 : i32, i32
  }
  func.func @transform_16(%arg0: i32) -> (i32, i32) {
    %c0_i32 = arith.constant 0 : i32
    %c0_i32_0 = arith.constant 0 : i32
    %c0_i32_1 = arith.constant 0 : i32
    return %c0_i32, %c0_i32_0 : i32, i32
  }
}

</mosaic_0001>

<bundles_post_ra>
// kernel: tpu_custom_call.1
= control target key start
LH: loop header
LB: loop body
LE: loop exit
PB: predicated region body
PF: predicated region fallthrough
CT: control target
= control target key end

     0   :  { %s1755_s0 = inlined_call_operand.vmem [shape: f32[16,32], index: 0, kind: input, shape index: {}]   ;;  %s1756_s1 = inlined_call_operand.hbm [shape: f32[2,8], index: 1, kind: input, shape index: {}]   ;;  %s1757_s2 = inlined_call_operand.hbm [shape: f32[1,32], index: 2, kind: input, shape index: {}]   ;;  %s1758_s3 = inlined_call_operand.hbm [shape: f32[1,32], index: 3, kind: input, shape index: {}]   ;;  %s1759_s4 = inlined_call_operand.vmem [shape: bf16[32,96], index: 4, kind: input, shape index: {}]   ;;  %s1760_s5 = inlined_call_operand.hbm [shape: f32[1,96], index: 5, kind: input, shape index: {}]   ;;  %s1761_s6 = inlined_call_operand.vmem [shape: bf16[32,32], index: 6, kind: input, shape index: {}]   ;;  %s1762_s7 = inlined_call_operand.hbm [shape: f32[1,32], index: 7, kind: input, shape index: {}]   ;;  %s1763_s8 = inlined_call_operand.hbm [shape: f32[1,32], index: 8, kind: input, shape index: {}]   ;;  %s1764_s9 = inlined_call_operand.hbm [shape: f32[1,32], index: 9, kind: input, shape index: {}]   ;;  %s1765_s10 = inlined_call_operand.vmem [shape: bf16[32,64], index: 10, kind: input, shape index: {}]   ;;  %s1766_s11 = inlined_call_operand.vmem [shape: f32[1,64], index: 11, kind: input, shape index: {}]   ;;  %s1767_s12 = inlined_call_operand.vmem [shape: bf16[64,32], index: 12, kind: input, shape index: {}]   ;;  %s1768_s13 = inlined_call_operand.vmem [shape: f32[1,32], index: 13, kind: input, shape index: {}]   ;;  %s1769_s14 = inlined_call_operand.vmem [shape: f32[1,32], index: 14, kind: input, shape index: {}]   ;;  %s1770_s15 = inlined_call_operand.vmem [shape: f32[1,32], index: 15, kind: input, shape index: {}]   ;;  %s1771_s16 = inlined_call_operand.hbm [shape: bf16[16,32], index: 16, kind: output, shape index: {}]  }
   0x1   :  { %1773 = sst [smem:[#allocation21_spill]] %s1755_s0 }
   0x2   :  { %21 = vsyncpa [#allocation4], 0 }
   0x3   :  { %22 = vsyncpa [#allocation7], 0 }
   0x4   :  { %23 = vsyncpa [#allocation10], 0 }
   0x5   :  { %24 = vsyncpa [#allocation13], 0 }
   0x6   :  { %25 = vsyncpa [#allocation5], 0  ;;  %s1469_s21 = smov [#allocation6]   ;;  %s1470_s23 = smov [#allocation9]  }
   0x7   :  { %s44_s22 = sshll.u32 %s1469_s21, 4  ;;  %s66_s24 = sshll.u32 %s1470_s23, 4  ;;  %s45_s22 = int_to_ptr.vmem [resolvable:$true] %s44_s22  ;;  %s67_s24 = int_to_ptr.vmem [resolvable:$true] %s66_s24 }
   0x8   :  { %s1307_s25 = scalar_lea.vmem %s45_s22, 16  ;;  %s1311_s26 = scalar_lea.vmem %s45_s22, 32 }
   0x9   :  { %p1308_p0 = scmp.ne.s32.totalorder %s45_s22, %s1307_s25  ;;  %p1312_p1 = scmp.lt.s32.totalorder %s45_s22, %s45_s22 }
   0xa   :  { %p1313_p2 = scmp.lt.s32.totalorder %s1311_s26, %s1307_s25 }
   0xc   :  { %p1314_p3 = por %p1313_p2, %p1312_p1 }
   0xe   :  { %p1315_p4 = pnand %p1314_p3, %p1308_p0 }
  0x10   :  { %1318 = shalt.err (!%p1315_p4)
}
  0x11   :  { %47 = dma.hbm_to_vmem [thread:$0]  %s1757_s2, 16, %s45_s22, [#allocation7]  }
  0x12   :  { %s1327_s29 = scalar_lea.vmem %s67_s24, 16  ;;  %s1331_s30 = scalar_lea.vmem %s67_s24, 32 }
  0x13   :  { %p1328_p5 = scmp.ne.s32.totalorder %s67_s24, %s1327_s29  ;;  %p1332_p6 = scmp.lt.s32.totalorder %s67_s24, %s67_s24 }
  0x14   :  { %p1333_p7 = scmp.lt.s32.totalorder %s1331_s30, %s1327_s29 }
  0x16   :  { %p1334_p8 = por %p1333_p7, %p1332_p6 }
  0x18   :  { %p1335_p9 = pnand %p1334_p8, %p1328_p5 }
  0x1a   :  { %1338 = shalt.err (!%p1335_p9)
}
  0x1b   :  { %69 = dma.hbm_to_vmem [thread:$0]  %s1760_s5, 16, %s67_s24, [#allocation10]  }
  0x1c   :  { %s1471_s18 = smov [#allocation12]   ;;  %s1472_s20 = smov [#allocation3]  }
  0x1d   :  { %s88_s19 = sshll.u32 %s1471_s18, 4  ;;  %s34_s21 = sshll.u32 %s1472_s20, 4  ;;  %s89_s19 = int_to_ptr.vmem [resolvable:$true] %s88_s19  ;;  %s35_s21 = int_to_ptr.vmem [resolvable:$true] %s34_s21 }
  0x1e   :  { %s1347_s23 = scalar_lea.vmem %s89_s19, 16  ;;  %s1351_s2 = scalar_lea.vmem %s89_s19, 32 }
  0x1f   :  { %p1348_p10 = scmp.ne.s32.totalorder %s89_s19, %s1347_s23  ;;  %p1352_p11 = scmp.lt.s32.totalorder %s89_s19, %s89_s19 }
  0x20   :  { %p1353_p12 = scmp.lt.s32.totalorder %s1351_s2, %s1347_s23 }
  0x22   :  { %p1354_p13 = por %p1353_p12, %p1352_p11 }
  0x24   :  { %p1355_p0 = pnand %p1354_p13, %p1348_p10 }
  0x26   :  { %1358 = shalt.err (!%p1355_p0)
}
  0x27   :  { %91 = dma.hbm_to_vmem [thread:$0]  %s1763_s8, 16, %s89_s19, [#allocation13]  }
  0x28   :  { %s1367_s26 = scalar_lea.vmem %s35_s21, 32  ;;  %p1372_p2 = scmp.lt.s32.totalorder %s35_s21, %s35_s21 }
  0x29   :  { %p1368_p1 = scmp.ne.s32.totalorder %s35_s21, %s1367_s26  ;;  %p1373_p3 = scmp.lt.s32.totalorder %s1367_s26, %s1367_s26 }
  0x2b   :  { %p1374_p4 = por %p1373_p3, %p1372_p2 }
  0x2d   :  { %p1375_p5 = pnand %p1374_p4, %p1368_p1 }
  0x2f   :  { %1378 = shalt.err (!%p1375_p5)
}
  0x30   :  { %37 = dma.hbm_to_vmem [thread:$0]  %s1756_s1, 32, %s35_s21, [#allocation4]  }
  0x31   :  { %s1473_s27 = smov [#allocation8]   ;;  %s1474_s29 = smov [#allocation11]  }
  0x32   :  { %s54_s28 = sshll.u32 %s1473_s27, 4  ;;  %s78_s30 = sshll.u32 %s1474_s29, 4  ;;  %s55_s28 = int_to_ptr.vmem [resolvable:$true] %s54_s28  ;;  %s79_s30 = int_to_ptr.vmem [resolvable:$true] %s78_s30 }
  0x33   :  { %s1387_s0 = scalar_lea.vmem %s55_s28, 16  ;;  %s1391_s8 = scalar_lea.vmem %s55_s28, 32 }
  0x34   :  { %p1388_p6 = scmp.ne.s32.totalorder %s55_s28, %s1387_s0  ;;  %p1392_p7 = scmp.lt.s32.totalorder %s55_s28, %s55_s28 }
  0x35   :  { %p1393_p8 = scmp.lt.s32.totalorder %s1391_s8, %s1387_s0 }
  0x37   :  { %p1394_p9 = por %p1393_p8, %p1392_p7 }
  0x39   :  { %p1395_p10 = pnand %p1394_p9, %p1388_p6 }
  0x3b   :  { %1398 = shalt.err (!%p1395_p10)
}
  0x3c   :  { %57 = dma.hbm_to_vmem [thread:$0]  %s1758_s3, 16, %s55_s28, [#allocation7]  }
  0x3d   :  { %s1407_s19 = scalar_lea.vmem %s79_s30, 16  ;;  %s1411_s1 = scalar_lea.vmem %s79_s30, 32 }
  0x3e   :  { %p1408_p11 = scmp.ne.s32.totalorder %s79_s30, %s1407_s19  ;;  %p1412_p12 = scmp.lt.s32.totalorder %s79_s30, %s79_s30 }
  0x3f   :  { %p1413_p13 = scmp.lt.s32.totalorder %s1411_s1, %s1407_s19 }
  0x41   :  { %p1414_p0 = por %p1413_p13, %p1412_p12 }
  0x43   :  { %p1415_p1 = pnand %p1414_p0, %p1408_p11 }
  0x45   :  { %1418 = shalt.err (!%p1415_p1)
}
  0x46   :  { %81 = dma.hbm_to_vmem [thread:$0]  %s1762_s7, 16, %s79_s30, [#allocation10]  }
  0x47   :  { %s1475_s23 = smov [#allocation14]  }
  0x48   :  { %s98_s2 = sshll.u32 %s1475_s23, 4  ;;  %s99_s2 = int_to_ptr.vmem [resolvable:$true] %s98_s2 }
  0x49   :  { %s1427_s22 = scalar_lea.vmem %s99_s2, 16  ;;  %s1431_s25 = scalar_lea.vmem %s99_s2, 32 }
  0x4a   :  { %p1428_p2 = scmp.ne.s32.totalorder %s99_s2, %s1427_s22  ;;  %p1432_p3 = scmp.lt.s32.totalorder %s99_s2, %s99_s2 }
  0x4b   :  { %p1433_p4 = scmp.lt.s32.totalorder %s1431_s25, %s1427_s22 }
  0x4d   :  { %p1434_p5 = por %p1433_p4, %p1432_p3 }
  0x4f   :  { %p1435_p6 = pnand %p1434_p5, %p1428_p2 }
  0x51   :  { %1438 = shalt.err (!%p1435_p6)
}
  0x52   :  { %101 = dma.hbm_to_vmem [thread:$0]  %s1764_s9, 16, %s99_s2, [#allocation13]  }
  0x53   :  { %1459 = dma.done.wait [#allocation4], 32  }
  0x54   :  { %1460 = vsyncadd [#allocation4], 4294967264 }
  0x55   :  { %1461 = dma.done.wait [#allocation7], 32  }
  0x56   :  { %1462 = vsyncadd [#allocation7], 4294967264 }
  0x57   :  { %1463 = dma.done.wait [#allocation10], 32  }
  0x58   :  { %1464 = vsyncadd [#allocation10], 4294967264 }
  0x59   :  { %1465 = dma.done.wait [#allocation13], 32  }
  0x5a   :  { %1466 = vsyncadd [#allocation13], 4294967264  ;;  %vm140_vm0 = vcmask 261120   ;;  %s1774_s24 = sld [smem:[#allocation21_spill]]  ;;  %v1257_v14 = vld [vmem:[%s1759_s4 + $0x8] sm:$0xff]   ;;  %v1476_v15 = vmov 0.0   ;;  %v307_v53 = vlaneseq }
  0x5b   :  { %1156 = vmatprep.subr.bf16.mxu0 %v1476_v15  ;;  %vm1477_vm1 = vmmov 0   ;;  %v1258_v16 = vld [vmem:[%s1759_s4] sm:$0xff]   ;;  %1164 = vmatprep.subr.bf16.mxu1 %v1476_v15  ;;  %v1090_v25 = vld [vmem:[#allocation6] ss:$0 sm:$0xff]  ;;  %v1091_v29 = vld [vmem:[#allocation8] ss:$0 sm:$0xff] }
  0x5c   :  { %1160 = vmatprep.mubr.msk.bf16.mxu0 %vm1477_vm1, %v1476_v15  ;;  %1157 = vmatpush3.bf16.msra.mxu0 %v1257_v14  ;;  %v1092_v35 = vld [vmem:[#allocation9] ss:$0 sm:$0xff]  ;;  %s1478_s4 = smov 80   ;;  %s1479_s8 = smov 96   ;;  %vm259_vm2 = vcmask 130048   ;;  %v308_v56 = vshrl.u32 %v307_v53, 7 }
  0x5d   :  { %1158 = vmatprep.subr.bf16.mxu0 %v1476_v15  ;;  %1166 = vmatprep.mubr.msk.bf16.mxu1 %vm1477_vm1, %v1476_v15  ;;  %s1480_s17 = smov 112   ;;  %v184_v54 = vld [vmem:[#allocation3] sm:$0x3]  ;;  %vm312_vm3 = vcmask 64512   ;;  %s1481_s18 = smov 48   ;;  %vm330_vm4 = vcmask 1043456  }
  0x5e   :  { %v185_v55 = vsub.f32 1.0, %v184_v54  ;;  %v309_v58 = vsub.s32 0, %v308_v56  ;;  %s1482_s19 = smov 64   ;;  %s1483_s1 = smov 16   ;;  %vm491_vm5 = vcmask 261248   ;;  %vm968_vm6 = vcmask 523264  }
  0x5f   :  { %vm1067_vm7 = vcmask 257024  }
  0x60   :  { %v136_v0 = vld [vmem:[%s1774_s24] sm:$0xff]  ;;  %v137_v1 = vld [vmem:[%s1774_s24 + $0x8] sm:$0xff]  ;;  %1159 = vmatpush3.bf16.msra.mxu0 %v1258_v16  ;;  %v186_v57 = vmul.f32 -10000.0, %v185_v55 }
  0x61   :  { %v141_v2 = vsel %vm140_vm0, %v136_v0, 0.0  ;;  %v144_v3 = vsel %vm140_vm0, %v137_v1, 0.0  ;;  %1170 = vmatprep.subr.bf16.mxu0 %v1476_v15 }
  0x62   :  { %142 = vadd.xlane.f32.xlu0 %v141_v2  ;;  %v310_v59 = vrot.slane %v186_v57, %v309_v58 }
  0x66   :  { %145 = vadd.xlane.f32.xlu0 %v144_v3 }
  0xeb   :  { %v143_v4 = vpop.xlane.xlu0 %142 }
  0xec   :  { %v148_v5 = vmul.f32 0.03125, %v143_v4 }
  0xee   :  { %v150_v6 = vsub.f32 %v136_v0, %v148_v5 }
  0xef   :  { %v146_v7 = vpop.xlane.xlu0 %145 }
  0xf0   :  { %v149_v8 = vmul.f32 0.03125, %v146_v7  ;;  %v152_v9 = vmul.f32 %v150_v6, %v150_v6  ;;  %v545_v7 = vsub.s32 1, %v308_v56 }
  0xf2   :  { %v151_v10 = vsub.f32 %v137_v1, %v149_v8  ;;  %v154_v11 = vsel %vm140_vm0, %v152_v9, 0.0 }
  0xf3   :  { %155 = vadd.xlane.f32.xlu1 %v154_v11  ;;  %v546_v11 = vrot.slane %v186_v57, %v545_v7 }
  0xf4   :  { %v153_v12 = vmul.f32 %v151_v10, %v151_v10 }
  0xf6   :  { %v157_v13 = vsel %vm140_vm0, %v153_v12, 0.0 }
  0xf7   :  { %158 = vadd.xlane.f32.xlu1 %v157_v13 }
 0x17c   :  { %v156_v17 = vpop.xlane.xlu1 %155 }
 0x17d   :  { %v160_v18 = vmul.f32 0.03125, %v156_v17 }
 0x17f   :  { %v162_v19 = vadd.f32 1e-12, %v160_v18 }
 0x180   :  { %v159_v20 = vpop.xlane.xlu1 %158 }
 0x181   :  { %1267 = vrsqrt.f32 %v162_v19  ;;  %v161_v21 = vmul.f32 0.03125, %v159_v20 }
 0x183   :  { %v163_v22 = vadd.f32 1e-12, %v161_v21 }
 0x185   :  { %1269 = vrsqrt.f32 %v163_v22 }
 0x18e   :  { %v1268_v23 = vpop.eup %1267 }
 0x18f   :  { %v166_v24 = vmul.f32 %v1268_v23, %v150_v6 }
 0x191   :  { %v174_v28 = vmul.f32 %v1090_v25, %v166_v24 }
 0x192   :  { %v1270_v26 = vpop.eup %1269 }
 0x193   :  { %v167_v27 = vmul.f32 %v1270_v26, %v151_v10  ;;  %v1616_v31 = vadd.f32 %v1091_v29, %v174_v28 }
 0x195   :  { %v175_v30 = vmul.f32 %v1090_v25, %v167_v27 }
 0x197   :  { %v1618_v32 = vadd.f32 %v1091_v29, %v175_v30 }
 0x199   :  { %v187_v33 = vpack.c.bf16 %v1618_v32, %v1616_v31 }
 0x19b   :  { %1161 = vmatmul.mubr.msk.bf16.vlgmr.msra.gmra.mxu0 %vm140_vm0, %v187_v33 }
 0x19c   :  { %1172 = vmatprep.mubr.msk.bf16.mxu0 %vm1477_vm1, %v1476_v15 }
 0x25b   :  { %v248_v34 = vpop.f32.mrf.mxu0 }
 0x25c   :  { %v249_v38 = vadd.f32 %v1092_v35, %v248_v34 }
 0x25d   :  { %v1162_v36 = vpop.f32.mrf.mxu0 }
 0x25f   :  { %v251_v37 = vpop.f32.mrf.mxu0 }
 0x260   :  { %v252_v39 = vadd.f32 %v1092_v35, %v251_v37 }
 0x261   :  { %v1163_v40 = vpop.f32.mrf.mxu0 }
 0x262   :  { %v1625_v41 = vpack.c.bf16 %v252_v39, %v249_v38 }
 0x264   :  { %377 = vrot.lane.b32.xlu1 %v1625_v41, %s1478_s4  ;;  %257 = vrot.lane.b32.xlu0 %v1625_v41, %s1479_s8  ;;  %v1630_v42 = vrot.slane %v1625_v41, 4 }
 0x268   :  { %375 = vrot.lane.b32.xlu1 %v1625_v41, %s1480_s17  ;;  %611 = vrot.lane.b32.xlu0 %v1630_v42, %s1478_s4 }
 0x26c   :  { %494 = vrot.lane.b32.xlu1 %v1630_v42, %s1479_s8 }
 0x270   :  { %609 = vrot.lane.b32.xlu1 %v1630_v42, %s1480_s17  ;;  %s1484_s17 = smov [#allocation15]  }
 0x2d6   :  { %v258_v43 = vpop.permute.xlu0 %257  ;;  %v378_v45 = vpop.permute.xlu1 %377 }
 0x2d7   :  { %v264_v44 = vsel %vm259_vm2, %v258_v43, 0  ;;  %v383_v47 = vsel %vm259_vm2, %v378_v45, 0 }
 0x2d8   :  { %1165 = vmatpush3.bf16.xpose.msra.mxu1 %v264_v44 }
 0x2d9   :  { %1176 = vmatprep.subr.bf16.mxu1 %v1476_v15 }
 0x2da   :  { %v376_v46 = vpop.permute.xlu1 %375  ;;  %v612_v50 = vpop.permute.xlu0 %611 }
 0x2db   :  { %v617_v51 = vsel %vm259_vm2, %v612_v50, 0 }
 0x2de   :  { %v495_v48 = vpop.permute.xlu1 %494 }
 0x2df   :  { %1167 = vmatmul.mubr.msk.bf16.vlgmr.msra.gmra.mxu1 %vm259_vm2, %v1625_v41  ;;  %v500_v49 = vsel %vm259_vm2, %v495_v48, 0 }
 0x2e0   :  { %1177 = vmatpush3.bf16.xpose.msra.mxu1 %v383_v47  ;;  %1178 = vmatprep.mubr.msk.bf16.mxu1 %vm1477_vm1, %v1476_v15 }
 0x2e1   :  { %1188 = vmatprep.subr.bf16.mxu1 %v1476_v15 }
 0x2e2   :  { %v610_v52 = vpop.permute.xlu1 %609 }
 0x2e7   :  { %1179 = vmatmul.mubr.msk.bf16.vlgmr.msra.gmra.mxu1 %vm259_vm2, %v376_v46 }
 0x2e8   :  { %1189 = vmatpush3.bf16.xpose.msra.mxu1 %v500_v49  ;;  %1190 = vmatprep.mubr.msk.bf16.mxu1 %vm1477_vm1, %v1476_v15 }
 0x2e9   :  { %1200 = vmatprep.subr.bf16.mxu1 %v1476_v15 }
 0x2ef   :  { %1191 = vmatmul.mubr.msk.bf16.vlgmr.msra.gmra.mxu1 %vm259_vm2, %v1630_v42 }
 0x2f0   :  { %1201 = vmatpush3.bf16.xpose.msra.mxu1 %v617_v51  ;;  %1202 = vmatprep.mubr.msk.bf16.mxu1 %vm1477_vm1, %v1476_v15 }
 0x2f1   :  { %1212 = vmatprep.subr.bf16.mxu1 %v1476_v15 }
 0x2f7   :  { %1203 = vmatmul.mubr.msk.bf16.vlgmr.msra.gmra.mxu1 %vm259_vm2, %v610_v52 }
 0x2f8   :  { %1216 = vmatprep.mubr.msk.bf16.mxu1 %vm1477_vm1, %v1476_v15 }
 0x39f   :  { %v300_v60 = vpop.f32.mrf.mxu1 }
 0x3a0   :  { %v306_v61 = vmul.f32 0.25, %v300_v60 }
 0x3a1   :  { %v1168_v62 = vpop.f32.mrf.mxu1 }
 0x3a2   :  { %v311_v63 = vadd.f32 %v310_v59, %v306_v61 }
 0x3a3   :  { %v303_v0 = vpop.f32.mrf.mxu1 }
 0x3a4   :  { %v313_v1 = vsel %vm312_vm3, %v311_v63, -inf }
 0x3a5   :  { %v1169_v2 = vpop.f32.mrf.mxu1  ;;  %314 = vmax.xlane.f32.xlu0 %v313_v1 }
 0x3a7   :  { %v419_v3 = vpop.f32.mrf.mxu1 }
 0x3a8   :  { %v425_v4 = vmul.f32 0.25, %v419_v3 }
 0x3a9   :  { %v1180_v5 = vpop.f32.mrf.mxu1 }
 0x3aa   :  { %v426_v6 = vadd.f32 %v425_v4, %v310_v59 }
 0x3ab   :  { %v422_v8 = vpop.f32.mrf.mxu1 }
 0x3ac   :  { %v427_v9 = vsel %vm312_vm3, %v426_v6, -inf }
 0x3ad   :  { %v1181_v10 = vpop.f32.mrf.mxu1  ;;  %428 = vmax.xlane.f32.xlu1 %v427_v9 }
 0x3af   :  { %v536_v12 = vpop.f32.mrf.mxu1 }
 0x3b0   :  { %v542_v13 = vmul.f32 0.25, %v536_v12 }
 0x3b1   :  { %v1192_v14 = vpop.f32.mrf.mxu1 }
 0x3b2   :  { %v547_v16 = vadd.f32 %v546_v11, %v542_v13 }
 0x3b3   :  { %v539_v17 = vpop.f32.mrf.mxu1 }
 0x3b4   :  { %v548_v18 = vsel %vm312_vm3, %v547_v16, -inf }
 0x3b5   :  { %549 = vmax.xlane.f32.xlu0 %v548_v18  ;;  %v1193_v19 = vpop.f32.mrf.mxu1 }
 0x3b7   :  { %v653_v20 = vpop.f32.mrf.mxu1 }
 0x3b8   :  { %v659_v21 = vmul.f32 0.25, %v653_v20 }
 0x3b9   :  { %v1204_v22 = vpop.f32.mrf.mxu1 }
 0x3ba   :  { %v660_v23 = vadd.f32 %v659_v21, %v546_v11  ;;  %v1259_v22 = vld [vmem:[%s1761_s6 + $0x8] sm:$0xff]  }
 0x3bb   :  { %v656_v24 = vpop.f32.mrf.mxu1  ;;  %1213 = vmatpush3.bf16.msra.mxu1 %v1259_v22 }
 0x3bc   :  { %v661_v25 = vsel %vm312_vm3, %v660_v23, -inf  ;;  %1214 = vmatprep.subr.bf16.mxu1 %v1476_v15 }
 0x3bd   :  { %662 = vmax.xlane.f32.xlu0 %v661_v25  ;;  %v1205_v26 = vpop.f32.mrf.mxu1 }
 0x42e   :  { %v315_v27 = vpop.xlane.xlu0 %314 }
 0x42f   :  { %v316_v28 = vsub.f32 %v311_v63, %v315_v27 }
 0x431   :  { %v317_v29 = vmul.f32 1.442695, %v316_v28 }
 0x433   :  { %1271 = vpow2.f32 %v317_v29 }
 0x436   :  { %v429_v30 = vpop.xlane.xlu1 %428 }
 0x437   :  { %v430_v33 = vsub.f32 %v426_v6, %v429_v30 }
 0x439   :  { %v431_v34 = vmul.f32 1.442695, %v430_v33 }
 0x43b   :  { %1273 = vpow2.f32 %v431_v34 }
 0x43e   :  { %v550_v35 = vpop.xlane.xlu0 %549 }
 0x43f   :  { %v551_v36 = vsub.f32 %v547_v16, %v550_v35  ;;  %v1104_v35 = vld [vmem:[#allocation11] ss:$0 sm:$0xff] }
 0x440   :  { %v1272_v37 = vpop.eup %1271 }
 0x441   :  { %v552_v38 = vmul.f32 1.442695, %v551_v36  ;;  %v319_v39 = vsel %vm312_vm3, %v1272_v37, 0.0 }
 0x442   :  { %320 = vadd.xlane.f32.xlu0 %v319_v39 }
 0x443   :  { %1275 = vpow2.f32 %v552_v38 }
 0x446   :  { %v663_v46 = vpop.xlane.xlu0 %662 }
 0x447   :  { %v664_v47 = vsub.f32 %v660_v23, %v663_v46  ;;  %v1260_v23 = vld [vmem:[%s1761_s6] sm:$0xff]  }
 0x448   :  { %v1274_v40 = vpop.eup %1273  ;;  %1215 = vmatpush3.bf16.msra.mxu1 %v1260_v23 }
 0x449   :  { %v433_v43 = vsel %vm312_vm3, %v1274_v40, 0.0  ;;  %v665_v48 = vmul.f32 1.442695, %v664_v47  ;;  %1228 = vmatprep.subr.bf16.mxu1 %v1476_v15 }
 0x44a   :  { %434 = vadd.xlane.f32.xlu1 %v433_v43 }
 0x44b   :  { %1277 = vpow2.f32 %v665_v48 }
 0x450   :  { %v1276_v44 = vpop.eup %1275 }
 0x451   :  { %v554_v45 = vsel %vm312_vm3, %v1276_v44, 0.0 }
 0x452   :  { %555 = vadd.xlane.f32.xlu0 %v554_v45 }
 0x458   :  { %v1278_v49 = vpop.eup %1277 }
 0x459   :  { %v667_v50 = vsel %vm312_vm3, %v1278_v49, 0.0 }
 0x45b   :  { %439 = vrot.lane.b32.xlu1 %v1625_v41, %s1481_s18 }
 0x45f   :  { %560 = vrot.lane.b32.xlu1 %v1630_v42, %s1482_s19 }
 0x468   :  { %325 = vrot.lane.b32.xlu0 %v1625_v41, %s1482_s19 }
 0x483   :  { %668 = vadd.xlane.f32.xlu1 %v667_v50 }
 0x494   :  { %673 = vrot.lane.b32.xlu1 %v1630_v42, %s1481_s18  ;;  %s1075_s18 = sshll.u32 %s1484_s17, 4  ;;  %s1076_s18 = int_to_ptr.vmem [resolvable:$true] %s1075_s18 }
 0x495   :  { %p1444_p8 = scmp.lt.s32.totalorder %s1076_s18, %s1076_s18 }
 0x4cb   :  { %v321_v51 = vpop.xlane.xlu0 %320 }
 0x4cc   :  { %1279 = vrcp.f32 %v321_v51 }
 0x4d3   :  { %v435_v52 = vpop.xlane.xlu1 %434 }
 0x4d4   :  { %1281 = vrcp.f32 %v435_v52 }
 0x4d7   :  { %v440_v57 = vpop.permute.xlu1 %439 }
 0x4d8   :  { %v445_v42 = vsel %vm330_vm4, %v440_v57, 0 }
 0x4d9   :  { %v1280_v53 = vpop.eup %1279 }
 0x4da   :  { %v323_v55 = vmul.f32 %v1280_v53, %v1272_v37 }
 0x4db   :  { %v556_v54 = vpop.xlane.xlu0 %555  ;;  %v561_v61 = vpop.permute.xlu1 %560 }
 0x4dc   :  { %1283 = vrcp.f32 %v556_v54  ;;  %v324_v58 = vpack.c.bf16 %v323_v55, %v323_v55  ;;  %v566_v0 = vsel %vm330_vm4, %v561_v61, 0 }
 0x4df   :  { %v326_v56 = vpop.permute.xlu0 %325 }
 0x4e0   :  { %v332_v41 = vsel %vm330_vm4, %v326_v56, 0 }
 0x4e1   :  { %1171 = vmatpush3.bf16.msra.mxu0 %v332_v41  ;;  %v1282_v59 = vpop.eup %1281  ;;  %v1262_v41 = vld [vmem:[%s1765_s10] sm:$0xff]  }
 0x4e2   :  { %1182 = vmatprep.subr.bf16.mxu0 %v1476_v15  ;;  %v437_v60 = vmul.f32 %v1282_v59, %v1274_v40 }
 0x4e4   :  { %1173 = vmatmul.mubr.msk.bf16.vlgmr.msra.gmra.mxu0 %vm312_vm3, %v324_v58  ;;  %v438_v62 = vpack.c.bf16 %v437_v60, %v437_v60 }
 0x4e5   :  { %1183 = vmatpush3.bf16.msra.mxu0 %v445_v42  ;;  %1184 = vmatprep.mubr.msk.bf16.mxu0 %vm1477_vm1, %v1476_v15 }
 0x4e6   :  { %1194 = vmatprep.subr.bf16.mxu0 %v1476_v15 }
 0x4e9   :  { %v1284_v63 = vpop.eup %1283 }
 0x4ea   :  { %v558_v1 = vmul.f32 %v1284_v63, %v1276_v44 }
 0x4ec   :  { %1185 = vmatmul.mubr.msk.bf16.vlgmr.msra.gmra.mxu0 %vm312_vm3, %v438_v62  ;;  %v559_v2 = vpack.c.bf16 %v558_v1, %v558_v1 }
 0x4ed   :  { %1195 = vmatpush3.bf16.msra.mxu0 %v566_v0  ;;  %1196 = vmatprep.mubr.msk.bf16.mxu0 %vm1477_vm1, %v1476_v15  ;;  %v1108_v0 = vld [vmem:[#allocation12] ss:$0 sm:$0xff] }
 0x4ee   :  { %1206 = vmatprep.subr.bf16.mxu0 %v1476_v15 }
 0x4f4   :  { %1197 = vmatmul.mubr.msk.bf16.vlgmr.msra.gmra.mxu0 %vm312_vm3, %v559_v2 }
 0x4f5   :  { %1208 = vmatprep.mubr.msk.bf16.mxu0 %vm1477_vm1, %v1476_v15 }
 0x50c   :  { %v669_v3 = vpop.xlane.xlu1 %668 }
 0x50d   :  { %1285 = vrcp.f32 %v669_v3 }
 0x510   :  { %v674_v4 = vpop.permute.xlu1 %673 }
 0x511   :  { %v679_v5 = vsel %vm330_vm4, %v674_v4, 0  ;;  %v1109_v4 = vld [vmem:[#allocation14] ss:$0 sm:$0xff] }
 0x512   :  { %1207 = vmatpush3.bf16.msra.mxu0 %v679_v5 }
 0x513   :  { %1220 = vmatprep.subr.bf16.mxu0 %v1476_v15 }
 0x51a   :  { %v1286_v6 = vpop.eup %1285 }
 0x51b   :  { %v671_v7 = vmul.f32 %v1286_v6, %v1278_v49 }
 0x51d   :  { %v672_v8 = vpack.c.bf16 %v671_v7, %v671_v7 }
 0x51f   :  { %1209 = vmatmul.mubr.msk.bf16.vlgmr.msra.gmra.mxu0 %vm312_vm3, %v672_v8 }
 0x520   :  { %1224 = vmatprep.mubr.msk.bf16.mxu0 %vm1477_vm1, %v1476_v15 }
 0x5a4   :  { %v368_v9 = vpop.f32.mrf.mxu0 }
 0x5a5   :  { %374 = vst.msk [vmem:[#allocation2] sm:$0xff] %vm259_vm2, %v368_v9  ;;  %v1263_v9 = vld [vmem:[%s1767_s12 + $0x18] sm:$0xff]  }
 0x5a6   :  { %v1174_v10 = vpop.f32.mrf.mxu0 }
 0x5a7   :  { %v1264_v10 = vld [vmem:[%s1767_s12 + $0x10] sm:$0xff]  }
 0x5a8   :  { %v371_v11 = vpop.f32.mrf.mxu0 }
 0x5a9   :  { %v1265_v11 = vld [vmem:[%s1767_s12 + $0x8] sm:$0xff]  }
 0x5aa   :  { %v1175_v12 = vpop.f32.mrf.mxu0 }
 0x5ab   :  { %v1266_v12 = vld [vmem:[%s1767_s12] sm:$0xff]  }
 0x5ac   :  { %v481_v13 = vpop.f32.mrf.mxu0 }
 0x5ad   :  { %488 = vrot.lane.b32.xlu0 %v481_v13, %s1483_s1  ;;  %v1110_v13 = vld [vmem:[%s1766_s11] ss:$0 sm:$0xff] }
 0x5ae   :  { %v1186_v14 = vpop.f32.mrf.mxu0 }
 0x5b0   :  { %v484_v16 = vpop.f32.mrf.mxu0 }
 0x5b2   :  { %v1187_v17 = vpop.f32.mrf.mxu0 }
 0x5b4   :  { %v602_v18 = vpop.f32.mrf.mxu0 }
 0x5b5   :  { %608 = vst.msk [vmem:[#allocation2 + $0x8] sm:$0xff] %vm259_vm2, %v602_v18 }
 0x5b6   :  { %v1198_v19 = vpop.f32.mrf.mxu0 }
 0x5b8   :  { %v605_v20 = vpop.f32.mrf.mxu0 }
 0x5ba   :  { %v1199_v21 = vpop.f32.mrf.mxu0 }
 0x5df   :  { %v715_v24 = vpop.f32.mrf.mxu0 }
 0x5e0   :  { %722 = vrot.lane.b32.xlu1 %v715_v24, %s1483_s1 }
 0x5e1   :  { %v1210_v25 = vpop.f32.mrf.mxu0 }
 0x5e3   :  { %v718_v26 = vpop.f32.mrf.mxu0 }
 0x5e5   :  { %v1211_v27 = vpop.f32.mrf.mxu0 }
 0x61f   :  { %v489_v28 = vpop.permute.xlu0 %488 }
 0x620   :  { %492 = vst.msk [vmem:[#allocation2] sm:$0xff] %vm491_vm5, %v489_v28 }
 0x627   :  { %v726_v30 = vld [vmem:[#allocation2] sm:$0xff] }
 0x652   :  { %v723_v29 = vpop.permute.xlu1 %722 }
 0x653   :  { %725 = vst.msk [vmem:[#allocation2 + $0x8] sm:$0xff] %vm491_vm5, %v723_v29 }
 0x65a   :  { %v727_v33 = vld [vmem:[#allocation2 + $0x8] sm:$0xff] }
 0x65b   :  { %v728_v34 = vpack.c.bf16 %v727_v33, %v726_v30 }
 0x65d   :  { %1217 = vmatmul.mubr.msk.bf16.vlgmr.msra.gmra.mxu1 %vm140_vm0, %v728_v34 }
 0x65e   :  { %1236 = vmatprep.mubr.msk.bf16.mxu1 %vm1477_vm1, %v1476_v15  ;;  %1229 = vmatpush3.bf16.msra.mxu1 %v1263_v9 }
 0x65f   :  { %1230 = vmatprep.subr.bf16.mxu1 %v1476_v15 }
 0x662   :  { %1231 = vmatpush3.bf16.msra.mxu1 %v1264_v10 }
 0x663   :  { %1232 = vmatprep.subr.bf16.mxu1 %v1476_v15 }
 0x666   :  { %1233 = vmatpush3.bf16.msra.mxu1 %v1265_v11 }
 0x667   :  { %1234 = vmatprep.subr.bf16.mxu1 %v1476_v15 }
 0x66a   :  { %1235 = vmatpush3.bf16.msra.mxu1 %v1266_v12 }
 0x71d   :  { %v789_v36 = vpop.f32.mrf.mxu1 }
 0x71e   :  { %v790_v37 = vadd.f32 %v1104_v35, %v789_v36 }
 0x71f   :  { %v1218_v38 = vpop.f32.mrf.mxu1 }
 0x720   :  { %v796_v39 = vadd.f32 %v790_v37, %v1616_v31 }
 0x721   :  { %v792_v40 = vpop.f32.mrf.mxu1 }
 0x722   :  { %v793_v43 = vadd.f32 %v1104_v35, %v792_v40  ;;  %v800_v44 = vsel %vm140_vm0, %v796_v39, 0.0 }
 0x723   :  { %801 = vadd.xlane.f32.xlu0 %v800_v44  ;;  %v1219_v45 = vpop.f32.mrf.mxu1 }
 0x724   :  { %v797_v46 = vadd.f32 %v793_v43, %v1618_v32  ;;  %v1261_v32 = vld [vmem:[%s1765_s10 + $0x8] sm:$0xff]   ;;  %v1114_v43 = vld [vmem:[%s1768_s13] ss:$0 sm:$0xff] }
 0x725   :  { %1221 = vmatpush3.bf16.msra.mxu0 %v1261_v32 }
 0x726   :  { %v803_v47 = vsel %vm140_vm0, %v797_v46, 0.0  ;;  %1222 = vmatprep.subr.bf16.mxu0 %v1476_v15 }
 0x727   :  { %804 = vadd.xlane.f32.xlu1 %v803_v47 }
 0x729   :  { %1223 = vmatpush3.bf16.msra.mxu0 %v1262_v41 }
 0x7ac   :  { %v802_v48 = vpop.xlane.xlu0 %801 }
 0x7ad   :  { %v806_v49 = vmul.f32 0.03125, %v802_v48 }
 0x7af   :  { %v808_v50 = vsub.f32 %v796_v39, %v806_v49 }
 0x7b0   :  { %v805_v51 = vpop.xlane.xlu1 %804 }
 0x7b1   :  { %v807_v52 = vmul.f32 0.03125, %v805_v51  ;;  %v810_v53 = vmul.f32 %v808_v50, %v808_v50 }
 0x7b3   :  { %v809_v54 = vsub.f32 %v797_v46, %v807_v52  ;;  %v812_v31 = vsel %vm140_vm0, %v810_v53, 0.0 }
 0x7b4   :  { %813 = vadd.xlane.f32.xlu0 %v812_v31 }
 0x7b5   :  { %v811_v55 = vmul.f32 %v809_v54, %v809_v54 }
 0x7b7   :  { %v815_v56 = vsel %vm140_vm0, %v811_v55, 0.0 }
 0x7b8   :  { %816 = vadd.xlane.f32.xlu0 %v815_v56 }
 0x83d   :  { %v814_v57 = vpop.xlane.xlu0 %813 }
 0x83e   :  { %v818_v58 = vmul.f32 0.03125, %v814_v57 }
 0x840   :  { %v820_v59 = vadd.f32 1e-12, %v818_v58 }
 0x841   :  { %v817_v42 = vpop.xlane.xlu0 %816 }
 0x842   :  { %1287 = vrsqrt.f32 %v820_v59  ;;  %v819_v60 = vmul.f32 0.03125, %v817_v42 }
 0x844   :  { %v821_v61 = vadd.f32 1e-12, %v819_v60 }
 0x846   :  { %1289 = vrsqrt.f32 %v821_v61 }
 0x84f   :  { %v1288_v62 = vpop.eup %1287 }
 0x850   :  { %v824_v63 = vmul.f32 %v1288_v62, %v808_v50 }
 0x852   :  { %v832_v3 = vmul.f32 %v1108_v0, %v824_v63 }
 0x853   :  { %v1290_v1 = vpop.eup %1289 }
 0x854   :  { %v825_v2 = vmul.f32 %v1290_v1, %v809_v54  ;;  %v840_v6 = vadd.f32 %v1109_v4, %v832_v3  ;;  %v1120_v3 = vld [vmem:[%s1769_s14] ss:$0 sm:$0xff]  ;;  %s1439_s14 = scalar_lea.vmem %s1076_s18, 128 }
 0x855   :  { %p1440_p7 = scmp.ne.s32.totalorder %s1076_s18, %s1439_s14  ;;  %p1445_p9 = scmp.lt.s32.totalorder %s1439_s14, %s1439_s14 }
 0x856   :  { %v833_v5 = vmul.f32 %v1108_v0, %v825_v2 }
 0x857   :  { %p1446_p10 = por %p1445_p9, %p1444_p8 }
 0x858   :  { %v841_v7 = vadd.f32 %v1109_v4, %v833_v5  ;;  %v1121_v5 = vld [vmem:[%s1770_s15] ss:$0 sm:$0xff] }
 0x859   :  { %p1447_p11 = pnand %p1446_p10, %p1440_p7 }
 0x85a   :  { %v842_v8 = vpack.c.bf16 %v841_v7, %v840_v6 }
 0x85c   :  { %1225 = vmatmul.mubr.msk.bf16.vlgmr.msra.gmra.mxu0 %vm140_vm0, %v842_v8 }
 0x91c   :  { %v903_v14 = vpop.f32.mrf.mxu0 }
 0x91d   :  { %v904_v16 = vadd.f32 %v1110_v13, %v903_v14 }
 0x91e   :  { %v1226_v17 = vpop.f32.mrf.mxu0 }
 0x91f   :  { %v912_v18 = vmul.f32 0.044715, %v904_v16  ;;  %v910_v35 = vmul.f32 0.5, %v904_v16 }
 0x920   :  { %v906_v19 = vpop.f32.mrf.mxu0 }
 0x921   :  { %v914_v20 = vmul.f32 %v912_v18, %v904_v16  ;;  %v907_v21 = vadd.f32 %v1110_v13, %v906_v19 }
 0x922   :  { %v1227_v22 = vpop.f32.mrf.mxu0 }
 0x923   :  { %v916_v23 = vmul.f32 %v914_v20, %v904_v16  ;;  %v913_v24 = vmul.f32 0.044715, %v907_v21  ;;  %v911_v36 = vmul.f32 0.5, %v907_v21 }
 0x925   :  { %v918_v25 = vadd.f32 %v916_v23, %v904_v16  ;;  %v915_v26 = vmul.f32 %v913_v24, %v907_v21 }
 0x927   :  { %v920_v27 = vmul.f32 0.7978846, %v918_v25  ;;  %v917_v28 = vmul.f32 %v915_v26, %v907_v21 }
 0x929   :  { %1291 = vtanh.f32 %v920_v27  ;;  %v919_v15 = vadd.f32 %v917_v28, %v907_v21 }
 0x92b   :  { %v921_v29 = vmul.f32 0.7978846, %v919_v15 }
 0x92d   :  { %1293 = vtanh.f32 %v921_v29 }
 0x936   :  { %v1292_v30 = vpop.eup %1291 }
 0x937   :  { %v924_v33 = vadd.f32 1.0, %v1292_v30 }
 0x939   :  { %v926_v38 = vmul.f32 %v924_v33, %v910_v35 }
 0x93a   :  { %v1294_v34 = vpop.eup %1293 }
 0x93b   :  { %v925_v37 = vadd.f32 1.0, %v1294_v34 }
 0x93d   :  { %v927_v39 = vmul.f32 %v925_v37, %v911_v36 }
 0x93f   :  { %v928_v40 = vpack.c.bf16 %v927_v39, %v926_v38 }
 0x941   :  { %1237 = vmatmul.mubr.msk.bf16.vlgmr.msra.gmra.mxu1 %vm968_vm6, %v928_v40 }
 0xa01   :  { %v1006_v44 = vpop.f32.mrf.mxu1 }
 0xa02   :  { %v1007_v45 = vadd.f32 %v1114_v43, %v1006_v44 }
 0xa03   :  { %v1238_v46 = vpop.f32.mrf.mxu1 }
 0xa04   :  { %v1013_v47 = vadd.f32 %v1007_v45, %v840_v6 }
 0xa05   :  { %v1009_v48 = vpop.f32.mrf.mxu1 }
 0xa06   :  { %v1010_v49 = vadd.f32 %v1114_v43, %v1009_v48  ;;  %v1017_v50 = vsel %vm140_vm0, %v1013_v47, 0.0 }
 0xa07   :  { %1018 = vadd.xlane.f32.xlu0 %v1017_v50  ;;  %v1239_v51 = vpop.f32.mrf.mxu1 }
 0xa08   :  { %v1014_v52 = vadd.f32 %v1010_v49, %v841_v7 }
 0xa0a   :  { %v1020_v53 = vsel %vm140_vm0, %v1014_v52, 0.0 }
 0xa0b   :  { %1021 = vadd.xlane.f32.xlu1 %v1020_v53 }
 0xa90   :  { %v1019_v54 = vpop.xlane.xlu0 %1018 }
 0xa91   :  { %v1023_v31 = vmul.f32 0.03125, %v1019_v54 }
 0xa93   :  { %v1025_v55 = vsub.f32 %v1013_v47, %v1023_v31 }
 0xa94   :  { %v1022_v56 = vpop.xlane.xlu1 %1021 }
 0xa95   :  { %v1024_v32 = vmul.f32 0.03125, %v1022_v56  ;;  %v1027_v41 = vmul.f32 %v1025_v55, %v1025_v55 }
 0xa97   :  { %v1026_v57 = vsub.f32 %v1014_v52, %v1024_v32  ;;  %v1029_v58 = vsel %vm140_vm0, %v1027_v41, 0.0 }
 0xa98   :  { %1030 = vadd.xlane.f32.xlu0 %v1029_v58 }
 0xa99   :  { %v1028_v59 = vmul.f32 %v1026_v57, %v1026_v57 }
 0xa9b   :  { %v1032_v42 = vsel %vm140_vm0, %v1028_v59, 0.0 }
 0xa9c   :  { %1033 = vadd.xlane.f32.xlu1 %v1032_v42 }
 0xb21   :  { %v1031_v60 = vpop.xlane.xlu0 %1030 }
 0xb22   :  { %v1035_v61 = vmul.f32 0.03125, %v1031_v60 }
 0xb24   :  { %v1037_v62 = vadd.f32 1e-12, %v1035_v61 }
 0xb25   :  { %v1034_v63 = vpop.xlane.xlu1 %1033 }
 0xb26   :  { %1295 = vrsqrt.f32 %v1037_v62  ;;  %v1036_v0 = vmul.f32 0.03125, %v1034_v63 }
 0xb28   :  { %v1038_v1 = vadd.f32 1e-12, %v1036_v0 }
 0xb2a   :  { %1297 = vrsqrt.f32 %v1038_v1 }
 0xb33   :  { %v1296_v2 = vpop.eup %1295 }
 0xb34   :  { %v1041_v4 = vmul.f32 %v1296_v2, %v1025_v55 }
 0xb36   :  { %v1049_v6 = vmul.f32 %v1120_v3, %v1041_v4 }
 0xb37   :  { %v1298_v7 = vpop.eup %1297 }
 0xb38   :  { %v1042_v8 = vmul.f32 %v1298_v7, %v1026_v57  ;;  %v1057_v9 = vadd.f32 %v1121_v5, %v1049_v6 }
 0xb3a   :  { %v1050_v10 = vmul.f32 %v1120_v3, %v1042_v8  ;;  %v1124_v11 = vpack.c.bf16 %v1057_v9, %v1057_v9 }
 0xb3c   :  { %v1058_v12 = vadd.f32 %v1121_v5, %v1050_v10  ;;  %1068 = vst.msk [vmem:[#allocation15] sm:$0xf] %vm1067_vm7, %v1124_v11 }
 0xb3e   :  { %v1125_v13 = vpack.c.bf16 %v1058_v12, %v1058_v12 }
 0xb40   :  { %1069 = vst.msk [vmem:[#allocation15 + $0x4] sm:$0xf] %vm1067_vm7, %v1125_v13 }
 0xb41   :  { %1450 = shalt.err (!%p1447_p11)
}
 0xb42   :  { %s1485_s15 = smov 4  }
 0xb43   :  { %1081 = dma.vmem_to_hbm [thread:$0]  %s1076_s18, 128, %s1771_s16, [#allocation5], %s1482_s19, %s1482_s19, %s1485_s15  }
 0xb44   :  { %1467 = dma.done.wait [#allocation5], 128  }
 0xb45   :  { %1468 = vsyncadd [#allocation5], 4294967168 }
 0xb46   :  { %1085 = vsyncpa [#allocation4], 1 }
 0xb47   :  { %1086 = vsyncpa [#allocation7], 1 }
 0xb48   :  { %1087 = vsyncpa [#allocation10], 1 }
 0xb49   :  { %1088 = vsyncpa [#allocation13], 1 }
 0xb4a   :  { %1089 = vsyncpa [#allocation5], 1 }

</bundles_post_ra>
